<compile_context>
chip_gen: v7x
topology: tpu7x:2x2x1
jax: 0.10.0
libtpu: 0.0.40
codegen_flags: <defaults>
</compile_context>

<pallas_src>
import jax
import jax.numpy as jnp
from jax import lax
from jax.experimental import pallas as pl
from jax.experimental.pallas import tpu as pltpu

# ---------------- model hyper-params (small, synthetic) ----------------
BATCH = 2
SEQ = 8
HIDDEN = 32
NUM_HEADS = 2
HEAD_DIM = HIDDEN // NUM_HEADS
FFN_DIM = 4 * HIDDEN
NUM_LAYERS = 2
VOCAB = 64
ADAPTER_REDUCTION = 4                  # args.adapter_size
ADAPTER_DIM = HIDDEN // ADAPTER_REDUCTION
ADAPTER_NONLIN = "relu"                # args.non_linearity
NUM_LABELS = 2
LANE_PAD = 128                         # lane-dense output width for the head
EPS = 1e-12
TOKENS = BATCH * SEQ


# --------------------------- in-kernel helpers ---------------------------
def _apply_act(y, act):
    if act == "gelu":
        return jax.nn.gelu(y)
    if act == "tanh":
        return jnp.tanh(y)
    if act == "relu":
        return jnp.maximum(y, 0.0)
    if act == "swish":
        return y * jax.nn.sigmoid(y)
    return y


def _ln(x, g, b):
    mu = jnp.mean(x, axis=-1, keepdims=True)
    var = jnp.mean((x - mu) ** 2, axis=-1, keepdims=True)
    return (x - mu) * jax.lax.rsqrt(var + EPS) * g + b


def _adapter_delta(y, wd, bd, wu, bu):
    # Houlsby bottleneck: up(act(down(y))); caller adds the residual.
    h = jnp.dot(y, wd, preferred_element_type=jnp.float32) + bd
    h = _apply_act(h, ADAPTER_NONLIN)
    return jnp.dot(h, wu, preferred_element_type=jnp.float32) + bu


# ----------------------- single fused forward kernel -----------------------
def fused_forward_kernel(x_emb_ref, embg_ref, embb_ref,
                         wqkv_ref, bqkv_ref, wo_ref, bo_ref,
                         awd1_ref, abd1_ref, awu1_ref, abu1_ref,
                         ln1g_ref, ln1b_ref,
                         w1_ref, b1_ref, w2_ref, b2_ref,
                         awd2_ref, abd2_ref, awu2_ref, abu2_ref,
                         ln2g_ref, ln2b_ref,
                         poolw_ref, poolb_ref, clsw_ref, clsb_ref,
                         o_ref,
                         x_sc):
    l = pl.program_id(0)

    # ---- layer 0 only: embedding LayerNorm into the resident scratch ----
    @pl.when(l == 0)
    def _():
        x_sc[...] = _ln(x_emb_ref[...], embg_ref[...], embb_ref[...])

    x = x_sc[...]                                                   # [T, H] f32

    # --- fused QKV projection (q already scaled by 1/sqrt(head_dim)) ---
    qkv = jnp.dot(x, wqkv_ref[0],
                  preferred_element_type=jnp.float32) + bqkv_ref[0]  # [T, 3H]

    # --- per-sequence, per-head attention (no transposes, ctx merged once) ---
    dn = (((1,), (1,)), ((), ()))        # contract dim 1 of q with dim 1 of k
    ctx_rows = []
    for b in range(BATCH):
        base = b * SEQ
        head_ctx = []
        for h in range(NUM_HEADS):
            lo = h * HEAD_DIM
            hi = lo + HEAD_DIM
            qh = qkv[base:base + SEQ, lo:hi]                        # [S, HD]
            kh = qkv[base:base + SEQ, HIDDEN + lo:HIDDEN + hi]
            vh = qkv[base:base + SEQ, 2 * HIDDEN + lo:2 * HIDDEN + hi]
            s = lax.dot_general(qh, kh, dn,
                                preferred_element_type=jnp.float32)  # [S, S]
            s = s - jnp.max(s, axis=-1, keepdims=True)
            p = jnp.exp(s)
            p = p / jnp.sum(p, axis=-1, keepdims=True)               # exact softmax
            head_ctx.append(jnp.dot(p, vh,
                                    preferred_element_type=jnp.float32))
        ctx_rows.append(jnp.concatenate(head_ctx, axis=-1))          # [S, H]
    ctx = jnp.concatenate(ctx_rows, axis=0)                          # [T, H]

    # single output projection for all heads / all sequences
    attn = jnp.dot(ctx, wo_ref[0],
                   preferred_element_type=jnp.float32) + bo_ref[0]

    # --- adapter after attention output, then residual + LN ---
    attn = attn + _adapter_delta(attn, awd1_ref[0], abd1_ref[0],
                                 awu1_ref[0], abu1_ref[0])
    x = _ln(x + attn, ln1g_ref[0], ln1b_ref[0])

    # --- feed-forward ---
    ff = jax.nn.gelu(jnp.dot(x, w1_ref[0],
                             preferred_element_type=jnp.float32) + b1_ref[0])
    ff = jnp.dot(ff, w2_ref[0], preferred_element_type=jnp.float32) + b2_ref[0]

    # --- adapter after FFN, then residual + LN ---
    ff = ff + _adapter_delta(ff, awd2_ref[0], abd2_ref[0],
                             awu2_ref[0], abu2_ref[0])
    x_new = _ln(x + ff, ln2g_ref[0], ln2b_ref[0])
    x_sc[...] = x_new                                                # stays in VMEM

    # ---- last layer only: tanh pooler on [CLS] + classification head ----
    @pl.when(l == pl.num_programs(0) - 1)
    def _():
        cls = jnp.concatenate(
            [x_new[b * SEQ:b * SEQ + 1, :] for b in range(BATCH)], axis=0)  # [B, H]
        pooled = jnp.tanh(jnp.dot(cls, poolw_ref[...],
                                  preferred_element_type=jnp.float32)
                          + poolb_ref[...])
        o_ref[...] = (jnp.dot(pooled, clsw_ref[...],
                              preferred_element_type=jnp.float32)
                      + clsb_ref[...]).astype(o_ref.dtype)           # [B, 128] lane-dense


def fused_forward(x_emb, prepped):
    const2 = lambda l: (0, 0)
    layer3 = lambda l: (l, 0, 0)

    x_spec = pl.BlockSpec((TOKENS, HIDDEN), const2)
    emb_spec = pl.BlockSpec((1, HIDDEN), const2)
    layer_specs = [pl.BlockSpec((1,) + t.shape[1:], layer3)
                   for t in prepped["layer_tensors"]]
    head_specs = [pl.BlockSpec(prepped["pool_w"].shape, const2),
                  pl.BlockSpec(prepped["pool_b"].shape, const2),
                  pl.BlockSpec(prepped["cls_w_pad"].shape, const2),
                  pl.BlockSpec(prepped["cls_b_pad"].shape, const2)]
    out_spec = pl.BlockSpec((BATCH, LANE_PAD), const2)

    return pl.pallas_call(
        fused_forward_kernel,
        out_shape=jax.ShapeDtypeStruct((BATCH, LANE_PAD), jnp.float32),
        grid=(NUM_LAYERS,),
        in_specs=[x_spec, emb_spec, emb_spec] + layer_specs + head_specs,
        out_specs=out_spec,
        scratch_shapes=[pltpu.VMEM((TOKENS, HIDDEN), jnp.float32)],
        compiler_params=pltpu.CompilerParams(
            dimension_semantics=("arbitrary",),          # layers are sequential
            vmem_limit_bytes=32 * 1024 * 1024),
    )(x_emb, prepped["emb_ln_g"], prepped["emb_ln_b"],
      *prepped["layer_tensors"],
      prepped["pool_w"], prepped["pool_b"],
      prepped["cls_w_pad"], prepped["cls_b_pad"])


# ------------------------- parameter construction -------------------------
def init_params(key):
    def normal(key, shape, scale=0.02):
        return scale * jax.random.normal(key, shape, dtype=jnp.float32)

    keys = iter(jax.random.split(key, 256))
    p = {
        "word_emb": normal(next(keys), (VOCAB, HIDDEN)),
        "pos_emb": normal(next(keys), (SEQ, HIDDEN)),
        "emb_ln_g": jnp.ones((HIDDEN,), jnp.float32),
        "emb_ln_b": jnp.zeros((HIDDEN,), jnp.float32),
        "layers": [],
        "pool_w": normal(next(keys), (HIDDEN, HIDDEN)),
        "pool_b": jnp.zeros((HIDDEN,), jnp.float32),
        "cls_w": normal(next(keys), (HIDDEN, NUM_LABELS)),
        "cls_b": jnp.zeros((NUM_LABELS,), jnp.float32),
    }
    for _ in range(NUM_LAYERS):
        layer = {
            "wq": normal(next(keys), (HIDDEN, HIDDEN)),
            "bq": jnp.zeros((HIDDEN,), jnp.float32),
            "wk": normal(next(keys), (HIDDEN, HIDDEN)),
            "bk": jnp.zeros((HIDDEN,), jnp.float32),
            "wv": normal(next(keys), (HIDDEN, HIDDEN)),
            "bv": jnp.zeros((HIDDEN,), jnp.float32),
            "wo": normal(next(keys), (HIDDEN, HIDDEN)),
            "bo": jnp.zeros((HIDDEN,), jnp.float32),
            "ln1_g": jnp.ones((HIDDEN,), jnp.float32),
            "ln1_b": jnp.zeros((HIDDEN,), jnp.float32),
            "w1": normal(next(keys), (HIDDEN, FFN_DIM)),
            "b1": jnp.zeros((FFN_DIM,), jnp.float32),
            "w2": normal(next(keys), (FFN_DIM, HIDDEN)),
            "b2": jnp.zeros((HIDDEN,), jnp.float32),
            "ln2_g": jnp.ones((HIDDEN,), jnp.float32),   # <- was missing (KeyError fix)
            "ln2_b": jnp.zeros((HIDDEN,), jnp.float32),
            # Houlsby 'matching' adapters (after attention output & after FFN)
            "a_attn_wd": normal(next(keys), (HIDDEN, ADAPTER_DIM)),
            "a_attn_bd": jnp.zeros((ADAPTER_DIM,), jnp.float32),
            "a_attn_wu": normal(next(keys), (ADAPTER_DIM, HIDDEN)),
            "a_attn_bu": jnp.zeros((HIDDEN,), jnp.float32),
            "a_ffn_wd": normal(next(keys), (HIDDEN, ADAPTER_DIM)),
            "a_ffn_bd": jnp.zeros((ADAPTER_DIM,), jnp.float32),
            "a_ffn_wu": normal(next(keys), (ADAPTER_DIM, HIDDEN)),
            "a_ffn_bu": jnp.zeros((HIDDEN,), jnp.float32),
        }
        p["layers"].append(layer)
    return p


def prep_params(p):
    """One-time packing: per-layer weights stacked on a leading L axis,
    fused QKV (1/sqrt(head_dim) folded into wq/bq), 2-D biases,
    lane-padded classifier weights."""
    scale = 1.0 / (HEAD_DIM ** 0.5)

    def stack(fn):
        return jnp.stack([fn(lp) for lp in p["layers"]], axis=0)

    layer_tensors = [
        stack(lambda lp: jnp.concatenate(
            [lp["wq"] * scale, lp["wk"], lp["wv"]], axis=1)),          # wqkv [L,H,3H]
        stack(lambda lp: jnp.concatenate(
            [lp["bq"] * scale, lp["bk"], lp["bv"]])[None, :]),         # bqkv [L,1,3H]
        stack(lambda lp: lp["wo"]),                                    # [L,H,H]
        stack(lambda lp: lp["bo"][None, :]),                           # [L,1,H]
        stack(lambda lp: lp["a_attn_wd"]),                             # [L,H,A]
        stack(lambda lp: lp["a_attn_bd"][None, :]),                    # [L,1,A]
        stack(lambda lp: lp["a_attn_wu"]),                             # [L,A,H]
        stack(lambda lp: lp["a_attn_bu"][None, :]),                    # [L,1,H]
        stack(lambda lp: lp["ln1_g"][None, :]),
        stack(lambda lp: lp["ln1_b"][None, :]),
        stack(lambda lp: lp["w1"]),                                    # [L,H,F]
        stack(lambda lp: lp["b1"][None, :]),                           # [L,1,F]
        stack(lambda lp: lp["w2"]),                                    # [L,F,H]
        stack(lambda lp: lp["b2"][None, :]),
        stack(lambda lp: lp["a_ffn_wd"]),
        stack(lambda lp: lp["a_ffn_bd"][None, :]),
        stack(lambda lp: lp["a_ffn_wu"]),
        stack(lambda lp: lp["a_ffn_bu"][None, :]),
        stack(lambda lp: lp["ln2_g"][None, :]),
        stack(lambda lp: lp["ln2_b"][None, :]),
    ]
    cls_w_pad = jnp.zeros((HIDDEN, LANE_PAD), jnp.float32).at[:, :NUM_LABELS].set(p["cls_w"])
    cls_b_pad = jnp.zeros((1, LANE_PAD), jnp.float32).at[0, :NUM_LABELS].set(p["cls_b"])
    return {
        "word_emb": p["word_emb"], "pos_emb": p["pos_emb"],
        "emb_ln_g": p["emb_ln_g"][None, :], "emb_ln_b": p["emb_ln_b"][None, :],
        "layer_tensors": layer_tensors,
        "pool_w": p["pool_w"], "pool_b": p["pool_b"][None, :],
        "cls_w_pad": cls_w_pad, "cls_b_pad": cls_b_pad,
    }


# ------------------------------- forward -------------------------------
@jax.jit
def adapter_em_forward(prepped, token_ids):
    """token_ids: [B, S] int32 -> logits [B, NUM_LABELS]."""
    b, s = token_ids.shape
    # Embedding gather (glue in plain JAX), then one fused pallas_call.
    x = jnp.take(prepped["word_emb"], token_ids, axis=0) + prepped["pos_emb"][None, :, :]
    x = x.reshape(b * s, HIDDEN)
    logits_pad = fused_forward(x, prepped)
    return logits_pad[:, :NUM_LABELS]
    # TODO(synk): pretrained BERT weights / adapter checkpoints (load_adapter,
    # train_adapter freezing, snli/tapt stacking) have no in-script equivalent;
    # parameters are deterministic synthetic initializations.


if __name__ == "__main__":
    key = jax.random.PRNGKey(0)
    pkey, xkey = jax.random.split(key)
    params = init_params(pkey)
    prepped = prep_params(params)
    token_ids = jax.random.randint(xkey, (BATCH, SEQ), 0, VOCAB, dtype=jnp.int32)

    logits = adapter_em_forward(prepped, token_ids)
    logits = jax.block_until_ready(logits)
    assert logits.shape == (BATCH, NUM_LABELS)
    assert logits.dtype == jnp.float32
    print("KERNEL_OK")
</pallas_src>

<mosaic_0001>
module attributes {stable_mosaic.version = 11 : i64} {
  func.func @fused_forward_kernel(%arg0: i32, %arg1: memref<16x32xf32, #tpu.memory_space<vmem>>, %arg2: memref<1x32xf32, #tpu.memory_space<vmem>>, %arg3: memref<1x32xf32, #tpu.memory_space<vmem>>, %arg4: memref<1x32x96xf32, #tpu.memory_space<vmem>>, %arg5: memref<1x1x96xf32, #tpu.memory_space<vmem>>, %arg6: memref<1x32x32xf32, #tpu.memory_space<vmem>>, %arg7: memref<1x1x32xf32, #tpu.memory_space<vmem>>, %arg8: memref<1x32x8xf32, #tpu.memory_space<vmem>>, %arg9: memref<1x1x8xf32, #tpu.memory_space<vmem>>, %arg10: memref<1x8x32xf32, #tpu.memory_space<vmem>>, %arg11: memref<1x1x32xf32, #tpu.memory_space<vmem>>, %arg12: memref<1x1x32xf32, #tpu.memory_space<vmem>>, %arg13: memref<1x1x32xf32, #tpu.memory_space<vmem>>, %arg14: memref<1x32x128xf32, #tpu.memory_space<vmem>>, %arg15: memref<1x1x128xf32, #tpu.memory_space<vmem>>, %arg16: memref<1x128x32xf32, #tpu.memory_space<vmem>>, %arg17: memref<1x1x32xf32, #tpu.memory_space<vmem>>, %arg18: memref<1x32x8xf32, #tpu.memory_space<vmem>>, %arg19: memref<1x1x8xf32, #tpu.memory_space<vmem>>, %arg20: memref<1x8x32xf32, #tpu.memory_space<vmem>>, %arg21: memref<1x1x32xf32, #tpu.memory_space<vmem>>, %arg22: memref<1x1x32xf32, #tpu.memory_space<vmem>>, %arg23: memref<1x1x32xf32, #tpu.memory_space<vmem>>, %arg24: memref<32x32xf32, #tpu.memory_space<vmem>>, %arg25: memref<1x32xf32, #tpu.memory_space<vmem>>, %arg26: memref<32x128xf32, #tpu.memory_space<vmem>>, %arg27: memref<1x128xf32, #tpu.memory_space<vmem>>, %arg28: memref<2x128xf32, #tpu.memory_space<vmem>>, %arg29: memref<16x32xf32, #tpu.memory_space<vmem>>) attributes {dimension_semantics = [#tpu.dimension_semantics<arbitrary>], iteration_bounds = array<i64: 2>, scalar_prefetch = 0 : i64, scratch_operands = 1 : i64, tpu.core_type = #tpu.core_type<tc>, window_params = [{pipeline_mode = #tpu.pipeline_mode<synchronous>, transform_indices = @transform_0, window_bounds = array<i64: 16, 32>}, {pipeline_mode = #tpu.pipeline_mode<synchronous>, transform_indices = @transform_1, window_bounds = array<i64: 1, 32>}, {pipeline_mode = #tpu.pipeline_mode<synchronous>, transform_indices = @transform_2, window_bounds = array<i64: 1, 32>}, {transform_indices = @transform_3, window_bounds = array<i64: 1, 32, 96>}, {transform_indices = @transform_4, window_bounds = array<i64: 1, 1, 96>}, {transform_indices = @transform_5, window_bounds = array<i64: 1, 32, 32>}, {transform_indices = @transform_6, window_bounds = array<i64: 1, 1, 32>}, {transform_indices = @transform_7, window_bounds = array<i64: 1, 32, 8>}, {transform_indices = @transform_8, window_bounds = array<i64: 1, 1, 8>}, {transform_indices = @transform_9, window_bounds = array<i64: 1, 8, 32>}, {transform_indices = @transform_10, window_bounds = array<i64: 1, 1, 32>}, {transform_indices = @transform_11, window_bounds = array<i64: 1, 1, 32>}, {transform_indices = @transform_12, window_bounds = array<i64: 1, 1, 32>}, {transform_indices = @transform_13, window_bounds = array<i64: 1, 32, 128>}, {transform_indices = @transform_14, window_bounds = array<i64: 1, 1, 128>}, {transform_indices = @transform_15, window_bounds = array<i64: 1, 128, 32>}, {transform_indices = @transform_16, window_bounds = array<i64: 1, 1, 32>}, {transform_indices = @transform_17, window_bounds = array<i64: 1, 32, 8>}, {transform_indices = @transform_18, window_bounds = array<i64: 1, 1, 8>}, {transform_indices = @transform_19, window_bounds = array<i64: 1, 8, 32>}, {transform_indices = @transform_20, window_bounds = array<i64: 1, 1, 32>}, {transform_indices = @transform_21, window_bounds = array<i64: 1, 1, 32>}, {transform_indices = @transform_22, window_bounds = array<i64: 1, 1, 32>}, {pipeline_mode = #tpu.pipeline_mode<synchronous>, transform_indices = @transform_23, window_bounds = array<i64: 32, 32>}, {pipeline_mode = #tpu.pipeline_mode<synchronous>, transform_indices = @transform_24, window_bounds = array<i64: 1, 32>}, {pipeline_mode = #tpu.pipeline_mode<synchronous>, transform_indices = @transform_25, window_bounds = array<i64: 32, 128>}, {pipeline_mode = #tpu.pipeline_mode<synchronous>, transform_indices = @transform_26, window_bounds = array<i64: 1, 128>}, {pipeline_mode = #tpu.pipeline_mode<synchronous>, transform_indices = @transform_27, window_bounds = array<i64: 2, 128>}]} {
    %c0_i32 = arith.constant 0 : i32
    %0 = arith.cmpi eq, %arg0, %c0_i32 : i32
    %1 = arith.extui %0 : i1 to i32
    %c0_i32_0 = arith.constant 0 : i32
    %2 = arith.cmpi ne, %1, %c0_i32_0 : i32
    scf.if %2 {
      %c0_104 = arith.constant 0 : index
      %c0_105 = arith.constant 0 : index
      %196 = vector.load %arg1[%c0_104, %c0_105] : memref<16x32xf32, #tpu.memory_space<vmem>>, vector<16x32xf32>
      %c0_106 = arith.constant 0 : index
      %c0_107 = arith.constant 0 : index
      %197 = vector.load %arg2[%c0_106, %c0_107] : memref<1x32xf32, #tpu.memory_space<vmem>>, vector<1x32xf32>
      %c0_108 = arith.constant 0 : index
      %c0_109 = arith.constant 0 : index
      %198 = vector.load %arg3[%c0_108, %c0_109] : memref<1x32xf32, #tpu.memory_space<vmem>>, vector<1x32xf32>
      %cst_110 = arith.constant dense<0.000000e+00> : vector<16xf32>
      %199 = vector.multi_reduction <add>, %196, %cst_110 [1] : vector<16x32xf32> to vector<16xf32>
      %200 = vector.shape_cast %199 : vector<16xf32> to vector<16x1xf32>
      %cst_111 = arith.constant 3.200000e+01 : f32
      %201 = vector.broadcast %cst_111 : f32 to vector<16x1xf32>
      %202 = arith.divf %200, %201 : vector<16x1xf32>
      %203 = vector.broadcast %202 : vector<16x1xf32> to vector<16x32xf32>
      %204 = arith.subf %196, %203 : vector<16x32xf32>
      %205 = arith.mulf %204, %204 : vector<16x32xf32>
      %cst_112 = arith.constant dense<0.000000e+00> : vector<16xf32>
      %206 = vector.multi_reduction <add>, %205, %cst_112 [1] : vector<16x32xf32> to vector<16xf32>
      %207 = vector.shape_cast %206 : vector<16xf32> to vector<16x1xf32>
      %cst_113 = arith.constant 3.200000e+01 : f32
      %208 = vector.broadcast %cst_113 : f32 to vector<16x1xf32>
      %209 = arith.divf %207, %208 : vector<16x1xf32>
      %210 = vector.broadcast %202 : vector<16x1xf32> to vector<16x32xf32>
      %211 = arith.subf %196, %210 : vector<16x32xf32>
      %cst_114 = arith.constant 9.99999996E-13 : f32
      %212 = vector.broadcast %cst_114 : f32 to vector<16x1xf32>
      %213 = arith.addf %209, %212 : vector<16x1xf32>
      %214 = math.rsqrt %213 : vector<16x1xf32>
      %215 = vector.broadcast %214 : vector<16x1xf32> to vector<16x32xf32>
      %216 = arith.mulf %211, %215 : vector<16x32xf32>
      %217 = vector.broadcast %197 : vector<1x32xf32> to vector<16x32xf32>
      %218 = arith.mulf %216, %217 : vector<16x32xf32>
      %219 = vector.broadcast %198 : vector<1x32xf32> to vector<16x32xf32>
      %220 = arith.addf %218, %219 : vector<16x32xf32>
      %c0_115 = arith.constant 0 : index
      %c0_116 = arith.constant 0 : index
      %221 = vector.load %arg29[%c0_115, %c0_116] : memref<16x32xf32, #tpu.memory_space<vmem>>, vector<16x32xf32>
      tpu.vector_store %arg29[%c0_115, %c0_116], %220 {strides = array<i32>} : memref<16x32xf32, #tpu.memory_space<vmem>>, vector<16x32xf32>,
    } else {
    }
    %c0 = arith.constant 0 : index
    %c0_1 = arith.constant 0 : index
    %3 = vector.load %arg29[%c0, %c0_1] : memref<16x32xf32, #tpu.memory_space<vmem>>, vector<16x32xf32>
    %c0_2 = arith.constant 0 : index
    %c0_3 = arith.constant 0 : index
    %c0_4 = arith.constant 0 : index
    %4 = vector.load %arg4[%c0_2, %c0_3, %c0_4] : memref<1x32x96xf32, #tpu.memory_space<vmem>>, vector<1x32x96xf32>
    %5 = vector.shape_cast %4 : vector<1x32x96xf32> to vector<32x96xf32>
    %cst = arith.constant dense<0.000000e+00> : vector<16x96xf32>
    %6 = tpu.matmul %3, %5, %cst {dimension_numbers = #tpu.dot_dimension_numbers<[1], [0], [0], [1], [0, 0, 1, 1], [], []>} : vector<16x32xf32>, vector<32x96xf32>, vector<16x96xf32> -> vector<16x96xf32>
    %c0_5 = arith.constant 0 : index
    %c0_6 = arith.constant 0 : index
    %c0_7 = arith.constant 0 : index
    %7 = vector.load %arg5[%c0_5, %c0_6, %c0_7] : memref<1x1x96xf32, #tpu.memory_space<vmem>>, vector<1x1x96xf32>
    %8 = vector.shape_cast %7 : vector<1x1x96xf32> to vector<1x96xf32>
    %9 = vector.broadcast %8 : vector<1x96xf32> to vector<16x96xf32>
    %10 = arith.addf %6, %9 : vector<16x96xf32>
    %11 = vector.extract_strided_slice %10 {offsets = [0, 0], sizes = [8, 16], strides = [1, 1]} : vector<16x96xf32> to vector<8x16xf32>
    %12 = vector.extract_strided_slice %10 {offsets = [0, 32], sizes = [8, 16], strides = [1, 1]} : vector<16x96xf32> to vector<8x16xf32>
    %13 = vector.extract_strided_slice %10 {offsets = [0, 64], sizes = [8, 16], strides = [1, 1]} : vector<16x96xf32> to vector<8x16xf32>
    %cst_8 = arith.constant dense<0.000000e+00> : vector<8x8xf32>
    %14 = tpu.matmul %11, %12, %cst_8 {dimension_numbers = #tpu.dot_dimension_numbers<[1], [1], [0], [0], [0, 0, 1, 0], [], []>} : vector<8x16xf32>, vector<8x16xf32>, vector<8x8xf32> -> vector<8x8xf32>
    %cst_9 = arith.constant dense<0xFF800000> : vector<8xf32>
    %15 = vector.multi_reduction <maximumf>, %14, %cst_9 [1] : vector<8x8xf32> to vector<8xf32>
    %16 = vector.shape_cast %15 : vector<8xf32> to vector<8x1xf32>
    %17 = vector.broadcast %16 : vector<8x1xf32> to vector<8x8xf32>
    %18 = arith.subf %14, %17 : vector<8x8xf32>
    %19 = math.exp %18 : vector<8x8xf32>
    %cst_10 = arith.constant dense<0.000000e+00> : vector<8xf32>
    %20 = vector.multi_reduction <add>, %19, %cst_10 [1] : vector<8x8xf32> to vector<8xf32>
    %21 = vector.shape_cast %20 : vector<8xf32> to vector<8x1xf32>
    %22 = vector.broadcast %21 : vector<8x1xf32> to vector<8x8xf32>
    %23 = arith.divf %19, %22 : vector<8x8xf32>
    %cst_11 = arith.constant dense<0.000000e+00> : vector<8x16xf32>
    %24 = tpu.matmul %23, %13, %cst_11 {dimension_numbers = #tpu.dot_dimension_numbers<[1], [0], [0], [1], [0, 0, 1, 1], [], []>} : vector<8x8xf32>, vector<8x16xf32>, vector<8x16xf32> -> vector<8x16xf32>
    %25 = vector.extract_strided_slice %10 {offsets = [0, 16], sizes = [8, 16], strides = [1, 1]} : vector<16x96xf32> to vector<8x16xf32>
    %26 = vector.extract_strided_slice %10 {offsets = [0, 48], sizes = [8, 16], strides = [1, 1]} : vector<16x96xf32> to vector<8x16xf32>
    %27 = vector.extract_strided_slice %10 {offsets = [0, 80], sizes = [8, 16], strides = [1, 1]} : vector<16x96xf32> to vector<8x16xf32>
    %cst_12 = arith.constant dense<0.000000e+00> : vector<8x8xf32>
    %28 = tpu.matmul %25, %26, %cst_12 {dimension_numbers = #tpu.dot_dimension_numbers<[1], [1], [0], [0], [0, 0, 1, 0], [], []>} : vector<8x16xf32>, vector<8x16xf32>, vector<8x8xf32> -> vector<8x8xf32>
    %cst_13 = arith.constant dense<0xFF800000> : vector<8xf32>
    %29 = vector.multi_reduction <maximumf>, %28, %cst_13 [1] : vector<8x8xf32> to vector<8xf32>
    %30 = vector.shape_cast %29 : vector<8xf32> to vector<8x1xf32>
    %31 = vector.broadcast %30 : vector<8x1xf32> to vector<8x8xf32>
    %32 = arith.subf %28, %31 : vector<8x8xf32>
    %33 = math.exp %32 : vector<8x8xf32>
    %cst_14 = arith.constant dense<0.000000e+00> : vector<8xf32>
    %34 = vector.multi_reduction <add>, %33, %cst_14 [1] : vector<8x8xf32> to vector<8xf32>
    %35 = vector.shape_cast %34 : vector<8xf32> to vector<8x1xf32>
    %36 = vector.broadcast %35 : vector<8x1xf32> to vector<8x8xf32>
    %37 = arith.divf %33, %36 : vector<8x8xf32>
    %cst_15 = arith.constant dense<0.000000e+00> : vector<8x16xf32>
    %38 = tpu.matmul %37, %27, %cst_15 {dimension_numbers = #tpu.dot_dimension_numbers<[1], [0], [0], [1], [0, 0, 1, 1], [], []>} : vector<8x8xf32>, vector<8x16xf32>, vector<8x16xf32> -> vector<8x16xf32>
    %39 = tpu.concatenate %24, %38 in 1 : vector<8x16xf32>, vector<8x16xf32> -> vector<8x32xf32>
    %40 = vector.extract_strided_slice %10 {offsets = [8, 0], sizes = [8, 16], strides = [1, 1]} : vector<16x96xf32> to vector<8x16xf32>
    %41 = vector.extract_strided_slice %10 {offsets = [8, 32], sizes = [8, 16], strides = [1, 1]} : vector<16x96xf32> to vector<8x16xf32>
    %42 = vector.extract_strided_slice %10 {offsets = [8, 64], sizes = [8, 16], strides = [1, 1]} : vector<16x96xf32> to vector<8x16xf32>
    %cst_16 = arith.constant dense<0.000000e+00> : vector<8x8xf32>
    %43 = tpu.matmul %40, %41, %cst_16 {dimension_numbers = #tpu.dot_dimension_numbers<[1], [1], [0], [0], [0, 0, 1, 0], [], []>} : vector<8x16xf32>, vector<8x16xf32>, vector<8x8xf32> -> vector<8x8xf32>
    %cst_17 = arith.constant dense<0xFF800000> : vector<8xf32>
    %44 = vector.multi_reduction <maximumf>, %43, %cst_17 [1] : vector<8x8xf32> to vector<8xf32>
    %45 = vector.shape_cast %44 : vector<8xf32> to vector<8x1xf32>
    %46 = vector.broadcast %45 : vector<8x1xf32> to vector<8x8xf32>
    %47 = arith.subf %43, %46 : vector<8x8xf32>
    %48 = math.exp %47 : vector<8x8xf32>
    %cst_18 = arith.constant dense<0.000000e+00> : vector<8xf32>
    %49 = vector.multi_reduction <add>, %48, %cst_18 [1] : vector<8x8xf32> to vector<8xf32>
    %50 = vector.shape_cast %49 : vector<8xf32> to vector<8x1xf32>
    %51 = vector.broadcast %50 : vector<8x1xf32> to vector<8x8xf32>
    %52 = arith.divf %48, %51 : vector<8x8xf32>
    %cst_19 = arith.constant dense<0.000000e+00> : vector<8x16xf32>
    %53 = tpu.matmul %52, %42, %cst_19 {dimension_numbers = #tpu.dot_dimension_numbers<[1], [0], [0], [1], [0, 0, 1, 1], [], []>} : vector<8x8xf32>, vector<8x16xf32>, vector<8x16xf32> -> vector<8x16xf32>
    %54 = vector.extract_strided_slice %10 {offsets = [8, 16], sizes = [8, 16], strides = [1, 1]} : vector<16x96xf32> to vector<8x16xf32>
    %55 = vector.extract_strided_slice %10 {offsets = [8, 48], sizes = [8, 16], strides = [1, 1]} : vector<16x96xf32> to vector<8x16xf32>
    %56 = vector.extract_strided_slice %10 {offsets = [8, 80], sizes = [8, 16], strides = [1, 1]} : vector<16x96xf32> to vector<8x16xf32>
    %cst_20 = arith.constant dense<0.000000e+00> : vector<8x8xf32>
    %57 = tpu.matmul %54, %55, %cst_20 {dimension_numbers = #tpu.dot_dimension_numbers<[1], [1], [0], [0], [0, 0, 1, 0], [], []>} : vector<8x16xf32>, vector<8x16xf32>, vector<8x8xf32> -> vector<8x8xf32>
    %cst_21 = arith.constant dense<0xFF800000> : vector<8xf32>
    %58 = vector.multi_reduction <maximumf>, %57, %cst_21 [1] : vector<8x8xf32> to vector<8xf32>
    %59 = vector.shape_cast %58 : vector<8xf32> to vector<8x1xf32>
    %60 = vector.broadcast %59 : vector<8x1xf32> to vector<8x8xf32>
    %61 = arith.subf %57, %60 : vector<8x8xf32>
    %62 = math.exp %61 : vector<8x8xf32>
    %cst_22 = arith.constant dense<0.000000e+00> : vector<8xf32>
    %63 = vector.multi_reduction <add>, %62, %cst_22 [1] : vector<8x8xf32> to vector<8xf32>
    %64 = vector.shape_cast %63 : vector<8xf32> to vector<8x1xf32>
    %65 = vector.broadcast %64 : vector<8x1xf32> to vector<8x8xf32>
    %66 = arith.divf %62, %65 : vector<8x8xf32>
    %cst_23 = arith.constant dense<0.000000e+00> : vector<8x16xf32>
    %67 = tpu.matmul %66, %56, %cst_23 {dimension_numbers = #tpu.dot_dimension_numbers<[1], [0], [0], [1], [0, 0, 1, 1], [], []>} : vector<8x8xf32>, vector<8x16xf32>, vector<8x16xf32> -> vector<8x16xf32>
    %68 = tpu.concatenate %53, %67 in 1 : vector<8x16xf32>, vector<8x16xf32> -> vector<8x32xf32>
    %69 = tpu.concatenate %39, %68 in 0 : vector<8x32xf32>, vector<8x32xf32> -> vector<16x32xf32>
    %c0_24 = arith.constant 0 : index
    %c0_25 = arith.constant 0 : index
    %c0_26 = arith.constant 0 : index
    %70 = vector.load %arg6[%c0_24, %c0_25, %c0_26] : memref<1x32x32xf32, #tpu.memory_space<vmem>>, vector<1x32x32xf32>
    %71 = vector.shape_cast %70 : vector<1x32x32xf32> to vector<32x32xf32>
    %cst_27 = arith.constant dense<0.000000e+00> : vector<16x32xf32>
    %72 = tpu.matmul %69, %71, %cst_27 {dimension_numbers = #tpu.dot_dimension_numbers<[1], [0], [0], [1], [0, 0, 1, 1], [], []>} : vector<16x32xf32>, vector<32x32xf32>, vector<16x32xf32> -> vector<16x32xf32>
    %c0_28 = arith.constant 0 : index
    %c0_29 = arith.constant 0 : index
    %c0_30 = arith.constant 0 : index
    %73 = vector.load %arg7[%c0_28, %c0_29, %c0_30] : memref<1x1x32xf32, #tpu.memory_space<vmem>>, vector<1x1x32xf32>
    %74 = vector.shape_cast %73 : vector<1x1x32xf32> to vector<1x32xf32>
    %75 = vector.broadcast %74 : vector<1x32xf32> to vector<16x32xf32>
    %76 = arith.addf %72, %75 : vector<16x32xf32>
    %c0_31 = arith.constant 0 : index
    %c0_32 = arith.constant 0 : index
    %c0_33 = arith.constant 0 : index
    %77 = vector.load %arg8[%c0_31, %c0_32, %c0_33] : memref<1x32x8xf32, #tpu.memory_space<vmem>>, vector<1x32x8xf32>
    %78 = vector.shape_cast %77 : vector<1x32x8xf32> to vector<32x8xf32>
    %c0_34 = arith.constant 0 : index
    %c0_35 = arith.constant 0 : index
    %c0_36 = arith.constant 0 : index
    %79 = vector.load %arg9[%c0_34, %c0_35, %c0_36] : memref<1x1x8xf32, #tpu.memory_space<vmem>>, vector<1x1x8xf32>
    %80 = vector.shape_cast %79 : vector<1x1x8xf32> to vector<1x8xf32>
    %c0_37 = arith.constant 0 : index
    %c0_38 = arith.constant 0 : index
    %c0_39 = arith.constant 0 : index
    %81 = vector.load %arg10[%c0_37, %c0_38, %c0_39] : memref<1x8x32xf32, #tpu.memory_space<vmem>>, vector<1x8x32xf32>
    %82 = vector.shape_cast %81 : vector<1x8x32xf32> to vector<8x32xf32>
    %c0_40 = arith.constant 0 : index
    %c0_41 = arith.constant 0 : index
    %c0_42 = arith.constant 0 : index
    %83 = vector.load %arg11[%c0_40, %c0_41, %c0_42] : memref<1x1x32xf32, #tpu.memory_space<vmem>>, vector<1x1x32xf32>
    %84 = vector.shape_cast %83 : vector<1x1x32xf32> to vector<1x32xf32>
    %cst_43 = arith.constant dense<0.000000e+00> : vector<16x8xf32>
    %85 = tpu.matmul %76, %78, %cst_43 {dimension_numbers = #tpu.dot_dimension_numbers<[1], [0], [0], [1], [0, 0, 1, 1], [], []>} : vector<16x32xf32>, vector<32x8xf32>, vector<16x8xf32> -> vector<16x8xf32>
    %86 = vector.broadcast %80 : vector<1x8xf32> to vector<16x8xf32>
    %87 = arith.addf %85, %86 : vector<16x8xf32>
    %cst_44 = arith.constant 0.000000e+00 : f32
    %88 = vector.broadcast %cst_44 : f32 to vector<16x8xf32>
    %89 = arith.maximumf %87, %88 : vector<16x8xf32>
    %cst_45 = arith.constant dense<0.000000e+00> : vector<16x32xf32>
    %90 = tpu.matmul %89, %82, %cst_45 {dimension_numbers = #tpu.dot_dimension_numbers<[1], [0], [0], [1], [0, 0, 1, 1], [], []>} : vector<16x8xf32>, vector<8x32xf32>, vector<16x32xf32> -> vector<16x32xf32>
    %91 = vector.broadcast %84 : vector<1x32xf32> to vector<16x32xf32>
    %92 = arith.addf %90, %91 : vector<16x32xf32>
    %93 = arith.addf %76, %92 : vector<16x32xf32>
    %94 = arith.addf %3, %93 : vector<16x32xf32>
    %c0_46 = arith.constant 0 : index
    %c0_47 = arith.constant 0 : index
    %c0_48 = arith.constant 0 : index
    %95 = vector.load %arg12[%c0_46, %c0_47, %c0_48] : memref<1x1x32xf32, #tpu.memory_space<vmem>>, vector<1x1x32xf32>
    %96 = vector.shape_cast %95 : vector<1x1x32xf32> to vector<1x32xf32>
    %c0_49 = arith.constant 0 : index
    %c0_50 = arith.constant 0 : index
    %c0_51 = arith.constant 0 : index
    %97 = vector.load %arg13[%c0_49, %c0_50, %c0_51] : memref<1x1x32xf32, #tpu.memory_space<vmem>>, vector<1x1x32xf32>
    %98 = vector.shape_cast %97 : vector<1x1x32xf32> to vector<1x32xf32>
    %cst_52 = arith.constant dense<0.000000e+00> : vector<16xf32>
    %99 = vector.multi_reduction <add>, %94, %cst_52 [1] : vector<16x32xf32> to vector<16xf32>
    %100 = vector.shape_cast %99 : vector<16xf32> to vector<16x1xf32>
    %cst_53 = arith.constant 3.200000e+01 : f32
    %101 = vector.broadcast %cst_53 : f32 to vector<16x1xf32>
    %102 = arith.divf %100, %101 : vector<16x1xf32>
    %103 = vector.broadcast %102 : vector<16x1xf32> to vector<16x32xf32>
    %104 = arith.subf %94, %103 : vector<16x32xf32>
    %105 = arith.mulf %104, %104 : vector<16x32xf32>
    %cst_54 = arith.constant dense<0.000000e+00> : vector<16xf32>
    %106 = vector.multi_reduction <add>, %105, %cst_54 [1] : vector<16x32xf32> to vector<16xf32>
    %107 = vector.shape_cast %106 : vector<16xf32> to vector<16x1xf32>
    %cst_55 = arith.constant 3.200000e+01 : f32
    %108 = vector.broadcast %cst_55 : f32 to vector<16x1xf32>
    %109 = arith.divf %107, %108 : vector<16x1xf32>
    %110 = vector.broadcast %102 : vector<16x1xf32> to vector<16x32xf32>
    %111 = arith.subf %94, %110 : vector<16x32xf32>
    %cst_56 = arith.constant 9.99999996E-13 : f32
    %112 = vector.broadcast %cst_56 : f32 to vector<16x1xf32>
    %113 = arith.addf %109, %112 : vector<16x1xf32>
    %114 = math.rsqrt %113 : vector<16x1xf32>
    %115 = vector.broadcast %114 : vector<16x1xf32> to vector<16x32xf32>
    %116 = arith.mulf %111, %115 : vector<16x32xf32>
    %117 = vector.broadcast %96 : vector<1x32xf32> to vector<16x32xf32>
    %118 = arith.mulf %116, %117 : vector<16x32xf32>
    %119 = vector.broadcast %98 : vector<1x32xf32> to vector<16x32xf32>
    %120 = arith.addf %118, %119 : vector<16x32xf32>
    %c0_57 = arith.constant 0 : index
    %c0_58 = arith.constant 0 : index
    %c0_59 = arith.constant 0 : index
    %121 = vector.load %arg14[%c0_57, %c0_58, %c0_59] : memref<1x32x128xf32, #tpu.memory_space<vmem>>, vector<1x32x128xf32>
    %122 = vector.shape_cast %121 : vector<1x32x128xf32> to vector<32x128xf32>
    %cst_60 = arith.constant dense<0.000000e+00> : vector<16x128xf32>
    %123 = tpu.matmul %120, %122, %cst_60 {dimension_numbers = #tpu.dot_dimension_numbers<[1], [0], [0], [1], [0, 0, 1, 1], [], []>} : vector<16x32xf32>, vector<32x128xf32>, vector<16x128xf32> -> vector<16x128xf32>
    %c0_61 = arith.constant 0 : index
    %c0_62 = arith.constant 0 : index
    %c0_63 = arith.constant 0 : index
    %124 = vector.load %arg15[%c0_61, %c0_62, %c0_63] : memref<1x1x128xf32, #tpu.memory_space<vmem>>, vector<1x1x128xf32>
    %125 = vector.shape_cast %124 : vector<1x1x128xf32> to vector<1x128xf32>
    %126 = vector.broadcast %125 : vector<1x128xf32> to vector<16x128xf32>
    %127 = arith.addf %123, %126 : vector<16x128xf32>
    %128 = arith.mulf %127, %127 : vector<16x128xf32>
    %129 = arith.mulf %127, %128 : vector<16x128xf32>
    %cst_64 = arith.constant 4.471500e-02 : f32
    %130 = vector.broadcast %cst_64 : f32 to vector<16x128xf32>
    %131 = arith.mulf %130, %129 : vector<16x128xf32>
    %132 = arith.addf %127, %131 : vector<16x128xf32>
    %cst_65 = arith.constant 0.797884583 : f32
    %133 = vector.broadcast %cst_65 : f32 to vector<16x128xf32>
    %134 = arith.mulf %133, %132 : vector<16x128xf32>
    %135 = math.tanh %134 : vector<16x128xf32>
    %cst_66 = arith.constant 1.000000e+00 : f32
    %136 = vector.broadcast %cst_66 : f32 to vector<16x128xf32>
    %137 = arith.addf %136, %135 : vector<16x128xf32>
    %cst_67 = arith.constant 5.000000e-01 : f32
    %138 = vector.broadcast %cst_67 : f32 to vector<16x128xf32>
    %139 = arith.mulf %138, %137 : vector<16x128xf32>
    %140 = arith.mulf %127, %139 : vector<16x128xf32>
    %c0_68 = arith.constant 0 : index
    %c0_69 = arith.constant 0 : index
    %c0_70 = arith.constant 0 : index
    %141 = vector.load %arg16[%c0_68, %c0_69, %c0_70] : memref<1x128x32xf32, #tpu.memory_space<vmem>>, vector<1x128x32xf32>
    %142 = vector.shape_cast %141 : vector<1x128x32xf32> to vector<128x32xf32>
    %cst_71 = arith.constant dense<0.000000e+00> : vector<16x32xf32>
    %143 = tpu.matmul %140, %142, %cst_71 {dimension_numbers = #tpu.dot_dimension_numbers<[1], [0], [0], [1], [0, 0, 1, 1], [], []>} : vector<16x128xf32>, vector<128x32xf32>, vector<16x32xf32> -> vector<16x32xf32>
    %c0_72 = arith.constant 0 : index
    %c0_73 = arith.constant 0 : index
    %c0_74 = arith.constant 0 : index
    %144 = vector.load %arg17[%c0_72, %c0_73, %c0_74] : memref<1x1x32xf32, #tpu.memory_space<vmem>>, vector<1x1x32xf32>
    %145 = vector.shape_cast %144 : vector<1x1x32xf32> to vector<1x32xf32>
    %146 = vector.broadcast %145 : vector<1x32xf32> to vector<16x32xf32>
    %147 = arith.addf %143, %146 : vector<16x32xf32>
    %c0_75 = arith.constant 0 : index
    %c0_76 = arith.constant 0 : index
    %c0_77 = arith.constant 0 : index
    %148 = vector.load %arg18[%c0_75, %c0_76, %c0_77] : memref<1x32x8xf32, #tpu.memory_space<vmem>>, vector<1x32x8xf32>
    %149 = vector.shape_cast %148 : vector<1x32x8xf32> to vector<32x8xf32>
    %c0_78 = arith.constant 0 : index
    %c0_79 = arith.constant 0 : index
    %c0_80 = arith.constant 0 : index
    %150 = vector.load %arg19[%c0_78, %c0_79, %c0_80] : memref<1x1x8xf32, #tpu.memory_space<vmem>>, vector<1x1x8xf32>
    %151 = vector.shape_cast %150 : vector<1x1x8xf32> to vector<1x8xf32>
    %c0_81 = arith.constant 0 : index
    %c0_82 = arith.constant 0 : index
    %c0_83 = arith.constant 0 : index
    %152 = vector.load %arg20[%c0_81, %c0_82, %c0_83] : memref<1x8x32xf32, #tpu.memory_space<vmem>>, vector<1x8x32xf32>
    %153 = vector.shape_cast %152 : vector<1x8x32xf32> to vector<8x32xf32>
    %c0_84 = arith.constant 0 : index
    %c0_85 = arith.constant 0 : index
    %c0_86 = arith.constant 0 : index
    %154 = vector.load %arg21[%c0_84, %c0_85, %c0_86] : memref<1x1x32xf32, #tpu.memory_space<vmem>>, vector<1x1x32xf32>
    %155 = vector.shape_cast %154 : vector<1x1x32xf32> to vector<1x32xf32>
    %cst_87 = arith.constant dense<0.000000e+00> : vector<16x8xf32>
    %156 = tpu.matmul %147, %149, %cst_87 {dimension_numbers = #tpu.dot_dimension_numbers<[1], [0], [0], [1], [0, 0, 1, 1], [], []>} : vector<16x32xf32>, vector<32x8xf32>, vector<16x8xf32> -> vector<16x8xf32>
    %157 = vector.broadcast %151 : vector<1x8xf32> to vector<16x8xf32>
    %158 = arith.addf %156, %157 : vector<16x8xf32>
    %cst_88 = arith.constant 0.000000e+00 : f32
    %159 = vector.broadcast %cst_88 : f32 to vector<16x8xf32>
    %160 = arith.maximumf %158, %159 : vector<16x8xf32>
    %cst_89 = arith.constant dense<0.000000e+00> : vector<16x32xf32>
    %161 = tpu.matmul %160, %153, %cst_89 {dimension_numbers = #tpu.dot_dimension_numbers<[1], [0], [0], [1], [0, 0, 1, 1], [], []>} : vector<16x8xf32>, vector<8x32xf32>, vector<16x32xf32> -> vector<16x32xf32>
    %162 = vector.broadcast %155 : vector<1x32xf32> to vector<16x32xf32>
    %163 = arith.addf %161, %162 : vector<16x32xf32>
    %164 = arith.addf %147, %163 : vector<16x32xf32>
    %165 = arith.addf %120, %164 : vector<16x32xf32>
    %c0_90 = arith.constant 0 : index
    %c0_91 = arith.constant 0 : index
    %c0_92 = arith.constant 0 : index
    %166 = vector.load %arg22[%c0_90, %c0_91, %c0_92] : memref<1x1x32xf32, #tpu.memory_space<vmem>>, vector<1x1x32xf32>
    %167 = vector.shape_cast %166 : vector<1x1x32xf32> to vector<1x32xf32>
    %c0_93 = arith.constant 0 : index
    %c0_94 = arith.constant 0 : index
    %c0_95 = arith.constant 0 : index
    %168 = vector.load %arg23[%c0_93, %c0_94, %c0_95] : memref<1x1x32xf32, #tpu.memory_space<vmem>>, vector<1x1x32xf32>
    %169 = vector.shape_cast %168 : vector<1x1x32xf32> to vector<1x32xf32>
    %cst_96 = arith.constant dense<0.000000e+00> : vector<16xf32>
    %170 = vector.multi_reduction <add>, %165, %cst_96 [1] : vector<16x32xf32> to vector<16xf32>
    %171 = vector.shape_cast %170 : vector<16xf32> to vector<16x1xf32>
    %cst_97 = arith.constant 3.200000e+01 : f32
    %172 = vector.broadcast %cst_97 : f32 to vector<16x1xf32>
    %173 = arith.divf %171, %172 : vector<16x1xf32>
    %174 = vector.broadcast %173 : vector<16x1xf32> to vector<16x32xf32>
    %175 = arith.subf %165, %174 : vector<16x32xf32>
    %176 = arith.mulf %175, %175 : vector<16x32xf32>
    %cst_98 = arith.constant dense<0.000000e+00> : vector<16xf32>
    %177 = vector.multi_reduction <add>, %176, %cst_98 [1] : vector<16x32xf32> to vector<16xf32>
    %178 = vector.shape_cast %177 : vector<16xf32> to vector<16x1xf32>
    %cst_99 = arith.constant 3.200000e+01 : f32
    %179 = vector.broadcast %cst_99 : f32 to vector<16x1xf32>
    %180 = arith.divf %178, %179 : vector<16x1xf32>
    %181 = vector.broadcast %173 : vector<16x1xf32> to vector<16x32xf32>
    %182 = arith.subf %165, %181 : vector<16x32xf32>
    %cst_100 = arith.constant 9.99999996E-13 : f32
    %183 = vector.broadcast %cst_100 : f32 to vector<16x1xf32>
    %184 = arith.addf %180, %183 : vector<16x1xf32>
    %185 = math.rsqrt %184 : vector<16x1xf32>
    %186 = vector.broadcast %185 : vector<16x1xf32> to vector<16x32xf32>
    %187 = arith.mulf %182, %186 : vector<16x32xf32>
    %188 = vector.broadcast %167 : vector<1x32xf32> to vector<16x32xf32>
    %189 = arith.mulf %187, %188 : vector<16x32xf32>
    %190 = vector.broadcast %169 : vector<1x32xf32> to vector<16x32xf32>
    %191 = arith.addf %189, %190 : vector<16x32xf32>
    %c0_101 = arith.constant 0 : index
    %c0_102 = arith.constant 0 : index
    %192 = vector.load %arg29[%c0_101, %c0_102] : memref<16x32xf32, #tpu.memory_space<vmem>>, vector<16x32xf32>
    tpu.vector_store %arg29[%c0_101, %c0_102], %191 {strides = array<i32>} : memref<16x32xf32, #tpu.memory_space<vmem>>, vector<16x32xf32>,
    %c1_i32 = arith.constant 1 : i32
    %193 = arith.cmpi eq, %arg0, %c1_i32 : i32
    %194 = arith.extui %193 : i1 to i32
    %c0_i32_103 = arith.constant 0 : i32
    %195 = arith.cmpi ne, %194, %c0_i32_103 : i32
    scf.if %195 {
      %196 = vector.extract_strided_slice %191 {offsets = [0, 0], sizes = [1, 32], strides = [1, 1]} : vector<16x32xf32> to vector<1x32xf32>
      %197 = vector.extract_strided_slice %191 {offsets = [8, 0], sizes = [1, 32], strides = [1, 1]} : vector<16x32xf32> to vector<1x32xf32>
      %198 = tpu.concatenate %196, %197 in 0 : vector<1x32xf32>, vector<1x32xf32> -> vector<2x32xf32>
      %c0_104 = arith.constant 0 : index
      %c0_105 = arith.constant 0 : index
      %199 = vector.load %arg24[%c0_104, %c0_105] : memref<32x32xf32, #tpu.memory_space<vmem>>, vector<32x32xf32>
      %cst_106 = arith.constant dense<0.000000e+00> : vector<2x32xf32>
      %200 = tpu.matmul %198, %199, %cst_106 {dimension_numbers = #tpu.dot_dimension_numbers<[1], [0], [0], [1], [0, 0, 1, 1], [], []>} : vector<2x32xf32>, vector<32x32xf32>, vector<2x32xf32> -> vector<2x32xf32>
      %c0_107 = arith.constant 0 : index
      %c0_108 = arith.constant 0 : index
      %201 = vector.load %arg25[%c0_107, %c0_108] : memref<1x32xf32, #tpu.memory_space<vmem>>, vector<1x32xf32>
      %202 = vector.broadcast %201 : vector<1x32xf32> to vector<2x32xf32>
      %203 = arith.addf %200, %202 : vector<2x32xf32>
      %204 = math.tanh %203 : vector<2x32xf32>
      %c0_109 = arith.constant 0 : index
      %c0_110 = arith.constant 0 : index
      %205 = vector.load %arg26[%c0_109, %c0_110] : memref<32x128xf32, #tpu.memory_space<vmem>>, vector<32x128xf32>
      %cst_111 = arith.constant dense<0.000000e+00> : vector<2x128xf32>
      %206 = tpu.matmul %204, %205, %cst_111 {dimension_numbers = #tpu.dot_dimension_numbers<[1], [0], [0], [1], [0, 0, 1, 1], [], []>} : vector<2x32xf32>, vector<32x128xf32>, vector<2x128xf32> -> vector<2x128xf32>
      %c0_112 = arith.constant 0 : index
      %c0_113 = arith.constant 0 : index
      %207 = vector.load %arg27[%c0_112, %c0_113] : memref<1x128xf32, #tpu.memory_space<vmem>>, vector<1x128xf32>
      %208 = vector.broadcast %207 : vector<1x128xf32> to vector<2x128xf32>
      %209 = arith.addf %206, %208 : vector<2x128xf32>
      %c0_114 = arith.constant 0 : index
      %c0_115 = arith.constant 0 : index
      %210 = vector.load %arg28[%c0_114, %c0_115] : memref<2x128xf32, #tpu.memory_space<vmem>>, vector<2x128xf32>
      tpu.vector_store %arg28[%c0_114, %c0_115], %209 {strides = array<i32>} : memref<2x128xf32, #tpu.memory_space<vmem>>, vector<2x128xf32>,
    } else {
    }
    return
  }
  func.func @transform_0(%arg0: i32) -> (i32, i32) {
    %c0_i32 = arith.constant 0 : i32
    %c0_i32_0 = arith.constant 0 : i32
    %c0_i32_1 = arith.constant 0 : i32
    return %c0_i32, %c0_i32_0 : i32, i32
  }
  func.func @transform_1(%arg0: i32) -> (i32, i32) {
    %c0_i32 = arith.constant 0 : i32
    %c0_i32_0 = arith.constant 0 : i32
    %c0_i32_1 = arith.constant 0 : i32
    return %c0_i32, %c0_i32_0 : i32, i32
  }
  func.func @transform_2(%arg0: i32) -> (i32, i32) {
    %c0_i32 = arith.constant 0 : i32
    %c0_i32_0 = arith.constant 0 : i32
    %c0_i32_1 = arith.constant 0 : i32
    return %c0_i32, %c0_i32_0 : i32, i32
  }
  func.func @transform_3(%arg0: i32) -> (i32, i32, i32) {
    %c0_i32 = arith.constant 0 : i32
    %c0_i32_0 = arith.constant 0 : i32
    %c0_i32_1 = arith.constant 0 : i32
    return %arg0, %c0_i32, %c0_i32_0 : i32, i32, i32
  }
  func.func @transform_4(%arg0: i32) -> (i32, i32, i32) {
    %c0_i32 = arith.constant 0 : i32
    %c0_i32_0 = arith.constant 0 : i32
    %c0_i32_1 = arith.constant 0 : i32
    return %arg0, %c0_i32, %c0_i32_0 : i32, i32, i32
  }
  func.func @transform_5(%arg0: i32) -> (i32, i32, i32) {
    %c0_i32 = arith.constant 0 : i32
    %c0_i32_0 = arith.constant 0 : i32
    %c0_i32_1 = arith.constant 0 : i32
    return %arg0, %c0_i32, %c0_i32_0 : i32, i32, i32
  }
  func.func @transform_6(%arg0: i32) -> (i32, i32, i32) {
    %c0_i32 = arith.constant 0 : i32
    %c0_i32_0 = arith.constant 0 : i32
    %c0_i32_1 = arith.constant 0 : i32
    return %arg0, %c0_i32, %c0_i32_0 : i32, i32, i32
  }
  func.func @transform_7(%arg0: i32) -> (i32, i32, i32) {
    %c0_i32 = arith.constant 0 : i32
    %c0_i32_0 = arith.constant 0 : i32
    %c0_i32_1 = arith.constant 0 : i32
    return %arg0, %c0_i32, %c0_i32_0 : i32, i32, i32
  }
  func.func @transform_8(%arg0: i32) -> (i32, i32, i32) {
    %c0_i32 = arith.constant 0 : i32
    %c0_i32_0 = arith.constant 0 : i32
    %c0_i32_1 = arith.constant 0 : i32
    return %arg0, %c0_i32, %c0_i32_0 : i32, i32, i32
  }
  func.func @transform_9(%arg0: i32) -> (i32, i32, i32) {
    %c0_i32 = arith.constant 0 : i32
    %c0_i32_0 = arith.constant 0 : i32
    %c0_i32_1 = arith.constant 0 : i32
    return %arg0, %c0_i32, %c0_i32_0 : i32, i32, i32
  }
  func.func @transform_10(%arg0: i32) -> (i32, i32, i32) {
    %c0_i32 = arith.constant 0 : i32
    %c0_i32_0 = arith.constant 0 : i32
    %c0_i32_1 = arith.constant 0 : i32
    return %arg0, %c0_i32, %c0_i32_0 : i32, i32, i32
  }
  func.func @transform_11(%arg0: i32) -> (i32, i32, i32) {
    %c0_i32 = arith.constant 0 : i32
    %c0_i32_0 = arith.constant 0 : i32
    %c0_i32_1 = arith.constant 0 : i32
    return %arg0, %c0_i32, %c0_i32_0 : i32, i32, i32
  }
  func.func @transform_12(%arg0: i32) -> (i32, i32, i32) {
    %c0_i32 = arith.constant 0 : i32
    %c0_i32_0 = arith.constant 0 : i32
    %c0_i32_1 = arith.constant 0 : i32
    return %arg0, %c0_i32, %c0_i32_0 : i32, i32, i32
  }
  func.func @transform_13(%arg0: i32) -> (i32, i32, i32) {
    %c0_i32 = arith.constant 0 : i32
    %c0_i32_0 = arith.constant 0 : i32
    %c0_i32_1 = arith.constant 0 : i32
    return %arg0, %c0_i32, %c0_i32_0 : i32, i32, i32
  }
  func.func @transform_14(%arg0: i32) -> (i32, i32, i32) {
    %c0_i32 = arith.constant 0 : i32
    %c0_i32_0 = arith.constant 0 : i32
    %c0_i32_1 = arith.constant 0 : i32
    return %arg0, %c0_i32, %c0_i32_0 : i32, i32, i32
  }
  func.func @transform_15(%arg0: i32) -> (i32, i32, i32) {
    %c0_i32 = arith.constant 0 : i32
    %c0_i32_0 = arith.constant 0 : i32
    %c0_i32_1 = arith.constant 0 : i32
    return %arg0, %c0_i32, %c0_i32_0 : i32, i32, i32
  }
  func.func @transform_16(%arg0: i32) -> (i32, i32, i32) {
    %c0_i32 = arith.constant 0 : i32
    %c0_i32_0 = arith.constant 0 : i32
    %c0_i32_1 = arith.constant 0 : i32
    return %arg0, %c0_i32, %c0_i32_0 : i32, i32, i32
  }
  func.func @transform_17(%arg0: i32) -> (i32, i32, i32) {
    %c0_i32 = arith.constant 0 : i32
    %c0_i32_0 = arith.constant 0 : i32
    %c0_i32_1 = arith.constant 0 : i32
    return %arg0, %c0_i32, %c0_i32_0 : i32, i32, i32
  }
  func.func @transform_18(%arg0: i32) -> (i32, i32, i32) {
    %c0_i32 = arith.constant 0 : i32
    %c0_i32_0 = arith.constant 0 : i32
    %c0_i32_1 = arith.constant 0 : i32
    return %arg0, %c0_i32, %c0_i32_0 : i32, i32, i32
  }
  func.func @transform_19(%arg0: i32) -> (i32, i32, i32) {
    %c0_i32 = arith.constant 0 : i32
    %c0_i32_0 = arith.constant 0 : i32
    %c0_i32_1 = arith.constant 0 : i32
    return %arg0, %c0_i32, %c0_i32_0 : i32, i32, i32
  }
  func.func @transform_20(%arg0: i32) -> (i32, i32, i32) {
    %c0_i32 = arith.constant 0 : i32
    %c0_i32_0 = arith.constant 0 : i32
    %c0_i32_1 = arith.constant 0 : i32
    return %arg0, %c0_i32, %c0_i32_0 : i32, i32, i32
  }
  func.func @transform_21(%arg0: i32) -> (i32, i32, i32) {
    %c0_i32 = arith.constant 0 : i32
    %c0_i32_0 = arith.constant 0 : i32
    %c0_i32_1 = arith.constant 0 : i32
    return %arg0, %c0_i32, %c0_i32_0 : i32, i32, i32
  }
  func.func @transform_22(%arg0: i32) -> (i32, i32, i32) {
    %c0_i32 = arith.constant 0 : i32
    %c0_i32_0 = arith.constant 0 : i32
    %c0_i32_1 = arith.constant 0 : i32
    return %arg0, %c0_i32, %c0_i32_0 : i32, i32, i32
  }
  func.func @transform_23(%arg0: i32) -> (i32, i32) {
    %c0_i32 = arith.constant 0 : i32
    %c0_i32_0 = arith.constant 0 : i32
    %c0_i32_1 = arith.constant 0 : i32
    return %c0_i32, %c0_i32_0 : i32, i32
  }
  func.func @transform_24(%arg0: i32) -> (i32, i32) {
    %c0_i32 = arith.constant 0 : i32
    %c0_i32_0 = arith.constant 0 : i32
    %c0_i32_1 = arith.constant 0 : i32
    return %c0_i32, %c0_i32_0 : i32, i32
  }
  func.func @transform_25(%arg0: i32) -> (i32, i32) {
    %c0_i32 = arith.constant 0 : i32
    %c0_i32_0 = arith.constant 0 : i32
    %c0_i32_1 = arith.constant 0 : i32
    return %c0_i32, %c0_i32_0 : i32, i32
  }
  func.func @transform_26(%arg0: i32) -> (i32, i32) {
    %c0_i32 = arith.constant 0 : i32
    %c0_i32_0 = arith.constant 0 : i32
    %c0_i32_1 = arith.constant 0 : i32
    return %c0_i32, %c0_i32_0 : i32, i32
  }
  func.func @transform_27(%arg0: i32) -> (i32, i32) {
    %c0_i32 = arith.constant 0 : i32
    %c0_i32_0 = arith.constant 0 : i32
    %c0_i32_1 = arith.constant 0 : i32
    return %c0_i32, %c0_i32_0 : i32, i32
  }
}

</mosaic_0001>

<bundles_post_ra>
// kernel: adapter_em_forward.1
= control target key start
LH: loop header
LB: loop body
LE: loop exit
PB: predicated region body
PF: predicated region fallthrough
CT: control target
= control target key end

     0   :  { %s4143_s0 = inlined_call_operand.vmem [shape: f32[16,32], index: 0, kind: input, shape index: {}]   ;;  %s4144_s1 = inlined_call_operand.vmem [shape: f32[1,32], index: 1, kind: input, shape index: {}]   ;;  %s4145_s2 = inlined_call_operand.vmem [shape: f32[1,32], index: 2, kind: input, shape index: {}]   ;;  %s4146_s3 = inlined_call_operand.vmem [shape: f32[2,32,96], index: 3, kind: input, shape index: {}]   ;;  %s4147_s4 = inlined_call_operand.vmem [shape: f32[2,1,96], index: 4, kind: input, shape index: {}]   ;;  %s4148_s5 = inlined_call_operand.vmem [shape: f32[2,32,32], index: 5, kind: input, shape index: {}]   ;;  %s4149_s6 = inlined_call_operand.vmem [shape: f32[2,1,32], index: 6, kind: input, shape index: {}]   ;;  %s4150_s7 = inlined_call_operand.vmem [shape: f32[2,32,8], index: 7, kind: input, shape index: {}]   ;;  %s4151_s8 = inlined_call_operand.vmem [shape: f32[2,1,8], index: 8, kind: input, shape index: {}]   ;;  %s4152_s9 = inlined_call_operand.vmem [shape: f32[2,8,32], index: 9, kind: input, shape index: {}]   ;;  %s4153_s10 = inlined_call_operand.vmem [shape: f32[2,1,32], index: 10, kind: input, shape index: {}]   ;;  %s4154_s11 = inlined_call_operand.vmem [shape: f32[2,1,32], index: 11, kind: input, shape index: {}]   ;;  %s4155_s12 = inlined_call_operand.vmem [shape: f32[2,1,32], index: 12, kind: input, shape index: {}]   ;;  %s4156_s13 = inlined_call_operand.vmem [shape: f32[2,32,128], index: 13, kind: input, shape index: {}]   ;;  %s4157_s14 = inlined_call_operand.vmem [shape: f32[2,1,128], index: 14, kind: input, shape index: {}]   ;;  %s4158_s15 = inlined_call_operand.vmem [shape: f32[2,128,32], index: 15, kind: input, shape index: {}]   ;;  %s4159_s16 = inlined_call_operand.vmem [shape: f32[2,1,32], index: 16, kind: input, shape index: {}]   ;;  %s4160_s17 = inlined_call_operand.vmem [shape: f32[2,32,8], index: 17, kind: input, shape index: {}]   ;;  %s4161_s18 = inlined_call_operand.vmem [shape: f32[2,1,8], index: 18, kind: input, shape index: {}]   ;;  %s4162_s19 = inlined_call_operand.vmem [shape: f32[2,8,32], index: 19, kind: input, shape index: {}]   ;;  %s4163_s20 = inlined_call_operand.vmem [shape: f32[2,1,32], index: 20, kind: input, shape index: {}]   ;;  %s4164_s21 = inlined_call_operand.vmem [shape: f32[2,1,32], index: 21, kind: input, shape index: {}]   ;;  %s4165_s22 = inlined_call_operand.vmem [shape: f32[2,1,32], index: 22, kind: input, shape index: {}]   ;;  %s4166_s23 = inlined_call_operand.vmem [shape: f32[32,32], index: 23, kind: input, shape index: {}]   ;;  %s4167_s24 = inlined_call_operand.vmem [shape: f32[1,32], index: 24, kind: input, shape index: {}]   ;;  %s4168_s25 = inlined_call_operand.vmem [shape: f32[32,128], index: 25, kind: input, shape index: {}]   ;;  %s4169_s26 = inlined_call_operand.vmem [shape: f32[1,128], index: 26, kind: input, shape index: {}]   ;;  %s4170_s27 = inlined_call_operand.hbm [shape: f32[2,128], index: 27, kind: output, shape index: {}]  }
   0x1   :  { %4181 = sst [smem:[#allocation12_spill]] %s4143_s0 }
   0x2   :  { %4182 = sst [smem:[#allocation13_spill]] %s4144_s1 }
   0x3   :  { %4183 = sst [smem:[#allocation14_spill]] %s4145_s2 }
   0x4   :  { %4184 = sst [smem:[#allocation15_spill]] %s4146_s3 }
   0x5   :  { %4185 = sst [smem:[#allocation16_spill]] %s4147_s4 }
   0x6   :  { %4186 = sst [smem:[#allocation17_spill]] %s4148_s5 }
   0x7   :  { %4187 = sst [smem:[#allocation18_spill]] %s4149_s6 }
   0x8   :  { %4188 = sst [smem:[#allocation19_spill]] %s4150_s7 }
   0x9   :  { %4189 = sst [smem:[#allocation20_spill]] %s4151_s8 }
   0xa   :  { %4190 = sst [smem:[#allocation21_spill]] %s4152_s9 }
   0xb   :  { %4191 = sst [smem:[#allocation22_spill]] %s4153_s10 }
   0xc   :  { %4192 = sst [smem:[#allocation23_spill]] %s4154_s11 }
   0xd   :  { %4193 = sst [smem:[#allocation24_spill]] %s4156_s13 }
   0xe   :  { %4194 = sst [smem:[#allocation25_spill]] %s4165_s22 }
   0xf   :  { %4195 = sst [smem:[#allocation26_spill]] %s4166_s23 }
  0x10   :  { %4196 = sst [smem:[#allocation27_spill]] %s4167_s24 }
  0x11   :  { %4197 = sst [smem:[#allocation28_spill]] %s4168_s25 }
  0x12   :  { %4198 = sst [smem:[#allocation29_spill]] %s4169_s26 }
  0x13   :  { %4199 = sst [smem:[#allocation30_spill]] %s4170_s27 }
  0x14   :  { %32 = vsyncpa [#allocation4], 0  ;;  %s3758_s7 = smov 0  }
  0x15 LB: > { %4200 = sst [smem:[#allocation6_spill]] %s3604_s7  ;;  %s3764_s4 = sadd.s32 4294967295, %s3604_s7   ;;  %s3604_s7 = sphi %s3758_s7, %s38_s7  }
  0x16   : > { %4201 = sst [smem:[#allocation7_spill]] %s3764_s4  ;;  %p3111_p0 = scmp.ge.s32.totalorder %s3604_s7, 1 }
  0x17   : > { %p897_p1 = scmp.lt.s32.totalorder %s3604_s7, 3 }
  0x19   : > { %p898_p2 = pnand %p3111_p0, %p897_p1 }
  0x1b   : > { %901 = sbr.rel (%p898_p2) target bundleno = 4249 (0x1099), region = 128 }
  0x22   : > { %p1033_p3 = scmp.lt.s32.totalorder %s3764_s4, 1  ;;  %s4203_s1 = sld [smem:[#allocation15_spill]] }
  0x23   : > { %s4205_s3 = sld [smem:[#allocation17_spill]]  ;;  %s4208_s22 = sld [smem:[#allocation19_spill]] }
  0x24   : > { %s3770_s8 = scalar_select %p1033_p3, %s3764_s4, 1 }
  0x25   : > { %s4215_s13 = sld [smem:[#allocation24_spill]] }
  0x26   : > { %s3176_s30 = sshll.u32 %s3770_s8, 5  ;;  %s1093_s11 = scalar_lea.vmem %s4161_s18, %s3770_s8 }
  0x27   : > { %s3840_s28 = scalar_lea.vmem %s4160_s17, %s3176_s30  ;;  %s1100_s23 = scalar_lea.vmem %s4163_s20, %s3770_s8 }
  0x28   : > { %s3780_s6 = scalar_lea.vmem %s4203_s1, %s3176_s30  ;;  %s3118_s1 = sshll.u32 %s3770_s8, 3 }
  0x29   : > { %4204 = sst [smem:[#allocation8_spill]] %s3780_s6  ;;  %s3785_s7 = scalar_lea.vmem %s4205_s3, %s3176_s30 }
  0x2a   : > { %4206 = sst [smem:[#allocation9_spill]] %s3785_s7  ;;  %s3794_s9 = scalar_lea.vmem %s4208_s22, %s3176_s30 }
  0x2b   : > { %4209 = sst [smem:[#allocation10_spill]] %s3794_s9  ;;  %s4211_s3 = sld [smem:[#allocation21_spill]] }
  0x2c   : > { %s3821_s29 = scalar_lea.vmem %s4215_s13, %s3176_s30  ;;  %s3849_s9 = scalar_lea.vmem %s4162_s19, %s3118_s1 }
  0x2d   : > { %s1103_s27 = scalar_lea.vmem %s4164_s21, %s3770_s8  ;;  %s4216_s6 = sld [smem:[#allocation25_spill]] }
  0x2e   : > { %s4217_s13 = sld [smem:[#allocation7_spill]] }
  0x31   : > { %s3804_s0 = scalar_lea.vmem %s4211_s3, %s3118_s1 }
  0x32   : > { %4212 = sst [smem:[#allocation11_spill]] %s3804_s0  ;;  %s3180_s0 = sshll.u32 %s3770_s8, 7 }
  0x33   : > { %s3835_s22 = scalar_lea.vmem %s4158_s15, %s3180_s0  ;;  %s1106_s25 = scalar_lea.vmem %s4216_s6, %s3770_s8 }
  0x34   : > { %p3126_p4 = scmp.ne.s32.totalorder %s4217_s13, 0 }
  0x35   : > { %s4218_s3 = sld [smem:[#allocation12_spill]] (!%p3126_p4)  ;;  %vm1115_vm0 = vcmask (!%p3126_p4), 261120   ;;  %s4219_s24 = sld [smem:[#allocation13_spill]] (!%p3126_p4) }
  0x36   : > { %1110 = sbr.rel (%p3126_p4) target bundleno = 378 (0x17a), region = 132  ;;  %s4220_s7 = sld [smem:[#allocation14_spill]] (!%p3126_p4) }
  0x3b   : > { %v1111_v0 = vld [vmem:[%s4218_s3] sm:$0xff] (!%p3126_p4)  ;;  %v1112_v1 = vld [vmem:[%s4218_s3 + $0x8] sm:$0xff] (!%p3126_p4) }
  0x3c   : > { %v1116_v2 = vsel (!%p3126_p4), %vm1115_vm0, %v1111_v0, 0.0  ;;  %v1119_v3 = vsel (!%p3126_p4), %vm1115_vm0, %v1112_v1, 0.0  ;;  %v3127_v21 = vld [vmem:[%s4219_s24] ss:$0 sm:$0xff] (!%p3126_p4) }
  0x3d   : > { %1117 = vadd.xlane.f32.xlu0 %v1116_v2  ;;  %v3128_v23 = vld [vmem:[%s4220_s7] ss:$0 sm:$0xff] }
  0x41   : > { %1120 = vadd.xlane.f32.xlu0 %v1119_v3 }
  0xca   : > { %v1118_v4 = vpop.xlane.xlu0 %1117 }
  0xcb   : > { %v1123_v5 = vmul.f32 0.03125, %v1118_v4 }
  0xcd   : > { %v1125_v6 = vsub.f32 %v1111_v0, %v1123_v5 }
  0xce   : > { %v1121_v7 = vpop.xlane.xlu0 %1120 }
  0xcf   : > { %v1124_v8 = vmul.f32 0.03125, %v1121_v7  ;;  %v1127_v9 = vmul.f32 %v1125_v6, %v1125_v6 }
  0xd1   : > { %v1126_v10 = vsub.f32 %v1112_v1, %v1124_v8  ;;  %v1129_v11 = vsel %vm1115_vm0, %v1127_v9, 0.0 }
  0xd2   : > { %1130 = vadd.xlane.f32.xlu1 %v1129_v11 }
  0xd3   : > { %v1128_v12 = vmul.f32 %v1126_v10, %v1126_v10 }
  0xd5   : > { %v1132_v13 = vsel %vm1115_vm0, %v1128_v12, 0.0 }
  0xd6   : > { %1133 = vadd.xlane.f32.xlu1 %v1132_v13 }
 0x15f   : > { %v1131_v14 = vpop.xlane.xlu1 %1130 }
 0x160   : > { %v1135_v15 = vmul.f32 0.03125, %v1131_v14 }
 0x162   : > { %v1137_v16 = vadd.f32 1e-12, %v1135_v15 }
 0x163   : > { %v1134_v17 = vpop.xlane.xlu1 %1133 }
 0x164   : > { %3534 = vrsqrt.f32 %v1137_v16  ;;  %v1136_v18 = vmul.f32 0.03125, %v1134_v17 }
 0x166   : > { %v1138_v19 = vadd.f32 1e-12, %v1136_v18 }
 0x168   : > { %3536 = vrsqrt.f32 %v1138_v19 }
 0x16e   : > { %v3535_v20 = vpop.eup %3534 }
 0x16f   : > { %v1141_v22 = vmul.f32 %v3535_v20, %v1125_v6 }
 0x171   : > { %v1149_v24 = vmul.f32 %v3127_v21, %v1141_v22 }
 0x172   : > { %v3537_v25 = vpop.eup %3536 }
 0x173   : > { %v1157_v26 = vadd.f32 %v3128_v23, %v1149_v24  ;;  %v1142_v27 = vmul.f32 %v3537_v25, %v1126_v10 }
 0x175   : > { %1159 = vst.msk [vmem:[#allocation2] sm:$0xff] %vm1115_vm0, %v1157_v26  ;;  %v1150_v28 = vmul.f32 %v3127_v21, %v1142_v27 }
 0x177   : > { %v1158_v29 = vadd.f32 %v3128_v23, %v1150_v28 }
 0x179   : > { %1160 = vst.msk [vmem:[#allocation2 + $0x8] sm:$0xff] %vm1115_vm0, %v1158_v29 }
 0x17a PF: > { %s4221_s30 = sld [smem:[#allocation8_spill]]  ;;  %vm1174_vm1 = vcmask 261120   ;;  %v3606_v38 = vmov 0.0   ;;  %vm3607_vm2 = vmmov 0   ;;  %s4222_s10 = sld [smem:[#allocation16_spill]]  ;;  %vm1259_vm3 = vcmask 130048  }
 0x17b   : > { %3283 = vmatprep.subr.mxu0 %v3606_v38  ;;  %3285 = vmatprep.mubr.msk.f32.mxu0 %vm3607_vm2, %v3606_v38  ;;  %s3608_s2 = smov 112   ;;  %s3609_s13 = smov 96   ;;  %vm1334_vm4 = vcmask 64512  }
 0x17c   : > { %v3886_v35 = vld [vmem:[#allocation2] sm:$0xff]  ;;  %s3610_s26 = smov 80   ;;  %s3611_s24 = smov 64  }
 0x17d   : > { %3270 = vmatprep.mubr.msk.f32.mxu1 %vm1174_vm1, %v3886_v35  ;;  %s3612_s0 = smov 48   ;;  %s4224_s4 = sld [smem:[#allocation9_spill]] }
 0x17e   : > { %s4225_s7 = sld [smem:[#allocation10_spill]]  ;;  %s4226_s6 = sld [smem:[#allocation11_spill]] }
 0x180   : > { %v1163_v30 = vld [vmem:[%s4221_s30] sm:$0xff]  ;;  %v1164_v31 = vld [vmem:[%s4221_s30 + $0x8] sm:$0xff]  ;;  %v1165_v32 = vld [vmem:[%s4221_s30 + $0x10] sm:$0xff]  ;;  %s4223_s1 = scalar_lea.vmem %s4222_s10, %s3770_s8 }
 0x181   : > { %v3424_v33 = vpack.c.bf16 %v1164_v31, %v1163_v30  ;;  %v1166_v34 = vld [vmem:[%s4221_s30 + $0x18] sm:$0xff]  ;;  %v3890_v37 = vld [vmem:[#allocation2 + $0x8] sm:$0xff]  ;;  %v3129_v39 = vld [vmem:[%s4223_s1] ss:$0 sm:$0xff]  ;;  %s3613_s30 = smov 16   ;;  %s4227_s1 = sld [smem:[#allocation18_spill]] }
 0x182   : > { %v3428_v36 = vpack.c.bf16 %v1166_v34, %v1165_v32 }
 0x183   : > { %3425 = vmatprep.subr.bf16.mxu1 %v3424_v33  ;;  %v1926_v34 = vld [vmem:[%s4224_s4] sm:$0xff] }
 0x184   : > { %3427 = vmatpush3.bf16.msra.mxu1 %v3424_v33 }
 0x185   : > { %3429 = vmatprep.subr.bf16.mxu1 %v3428_v36 }
 0x188   : > { %3431 = vmatpush3.bf16.msra.mxu1 %v3428_v36  ;;  %v1927_v36 = vld [vmem:[%s4224_s4 + $0x8] sm:$0xff] }
 0x189   : > { %3273 = vmatprep.subr.mxu1 %v3606_v38 }
 0x18b   : > { %3271 = vmatmul.mubr.msk.f32.vlgmr.msra.gmra.mrb[0].mxu1 %vm1174_vm1, %v3890_v37 }
 0x18c   : > { %3275 = vmatprep.mubr.msk.f32.mxu1 %vm3607_vm2, %v3606_v38 }
 0x25e   : > { %v3272_v40 = vpop.f32.mrb[0].mxu1 }
 0x25f   : > { %v1247_v41 = vpop.f32.mrb[1].mxu1  ;;  %v3909_v43 = vadd.f32 %v3272_v40, %v3129_v39  ;;  %v1928_v40 = vld [vmem:[%s4224_s4 + $0x10] sm:$0xff] }
 0x260   : > { %v3905_v42 = vadd.f32 %v3129_v39, %v1247_v41  ;;  %v3432_v39 = vpack.c.bf16 %v1927_v36, %v1926_v34  ;;  %v1929_v41 = vld [vmem:[%s4224_s4 + $0x18] sm:$0xff]  ;;  %s4236_s4 = scalar_lea.vmem %s4157_s14, %s3770_s8 }
 0x262   : > { %1422 = vrot.lane.b32.xlu1 %v3905_v42, %s3608_s2  ;;  %1257 = vrot.lane.b32.xlu0 %v3905_v42, %s3609_s13 }
 0x266   : > { %1593 = vrot.lane.b32.xlu1 %v3909_v43, %s3609_s13  ;;  %1424 = vrot.lane.b32.xlu0 %v3905_v42, %s3610_s26 }
 0x26a   : > { %1756 = vrot.lane.b32.xlu1 %v3909_v43, %s3608_s2  ;;  %1758 = vrot.lane.b32.xlu0 %v3909_v43, %s3610_s26  ;;  %s4228_s2 = scalar_lea.vmem %s4227_s1, %s3770_s8  ;;  %s4233_s1 = sld [smem:[#allocation23_spill]] }
 0x26b   : > { %s4235_s26 = scalar_lea.vmem %s4155_s12, %s3770_s8 }
 0x2d4   : > { %v1258_v44 = vpop.permute.xlu0 %1257  ;;  %v1423_v45 = vpop.permute.xlu1 %1422 }
 0x2d5   : > { %3274 = vmatpush3.xpose.msk.msra.mxu1 %vm1259_vm3, %v1258_v44 }
 0x2d6   : > { %3278 = vmatprep.subr.mxu1 %v3606_v38 }
 0x2d8   : > { %3276 = vmatmul.mubr.msk.f32.vlgmr.msra.gmra.mrb[2].mxu1 %vm1259_vm3, %v3905_v42  ;;  %v1425_v46 = vpop.permute.xlu0 %1424  ;;  %v1594_v47 = vpop.permute.xlu1 %1593 }
 0x2d9   : > { %3284 = vmatpush3.xpose.msk.msra.mxu0 %vm1259_vm3, %v1425_v46  ;;  %3280 = vmatprep.mubr.msk.f32.mxu1 %vm3607_vm2, %v3606_v38  ;;  %v2019_v46 = vld [vmem:[%s4225_s7 + $0x8] sm:$0xff] }
 0x2da   : > { %3293 = vmatprep.subr.mxu0 %v3606_v38 }
 0x2dc   : > { %3286 = vmatmul.mubr.msk.f32.vlgmr.msra.gmra.mrb[0].mxu0 %vm1259_vm3, %v1423_v45  ;;  %v1759_v48 = vpop.permute.xlu0 %1758  ;;  %v1757_v49 = vpop.permute.xlu1 %1756  ;;  %v2018_v45 = vld [vmem:[%s4225_s7] sm:$0xff] }
 0x2dd   : > { %3294 = vmatpush3.xpose.msk.msra.mxu0 %vm1259_vm3, %v1594_v47  ;;  %3295 = vmatprep.mubr.msk.f32.mxu0 %vm3607_vm2, %v3606_v38  ;;  %v3440_v47 = vpack.c.bf16 %v2019_v46, %v2018_v45  ;;  %v3154_v46 = vld [vmem:[%s4235_s26] ss:$0 sm:$0xff] }
 0x2de   : > { %3303 = vmatprep.subr.mxu0 %v3606_v38 }
 0x2e0   : > { %3296 = vmatmul.mubr.msk.f32.vlgmr.msra.gmra.mrb[2].mxu0 %vm1259_vm3, %v3909_v43 }
 0x2e1   : > { %3304 = vmatpush3.xpose.msk.msra.mxu0 %vm1259_vm3, %v1759_v48  ;;  %3305 = vmatprep.mubr.msk.f32.mxu0 %vm3607_vm2, %v3606_v38 }
 0x2e2   : > { %3433 = vmatprep.subr.bf16.mxu0 %v3432_v39 }
 0x2e4   : > { %3306 = vmatmul.mubr.msk.f32.vlgmr.msra.gmra.mrb[4].mxu0 %vm1259_vm3, %v1757_v49 }
 0x2e5   : > { %3435 = vmatpush3.bf16.msra.mxu0 %v3432_v39 }
 0x3ab   : > { %v1330_v50 = vpop.f32.mrb[2].mxu1 }
 0x3ac   : > { %v3277_v51 = vpop.f32.mrb[3].mxu1  ;;  %v1335_v52 = vsel %vm1334_vm4, %v1330_v50, -inf }
 0x3ad   : > { %1336 = vmax.xlane.f32.xlu0 %v1335_v52 }
 0x3af   : > { %v1496_v53 = vpop.f32.mrb[0].mxu0 }
 0x3b0   : > { %v3287_v54 = vpop.f32.mrb[1].mxu0  ;;  %v1500_v55 = vsel %vm1334_vm4, %v1496_v53, -inf }
 0x3b1   : > { %1501 = vmax.xlane.f32.xlu1 %v1500_v55 }
 0x3b3   : > { %v1665_v56 = vpop.f32.mrb[2].mxu0 }
 0x3b4   : > { %v3297_v57 = vpop.f32.mrb[3].mxu0  ;;  %v1669_v58 = vsel %vm1334_vm4, %v1665_v56, -inf }
 0x3b5   : > { %1670 = vmax.xlane.f32.xlu0 %v1669_v58  ;;  %v2020_v57 = vld [vmem:[%s4225_s7 + $0x10] sm:$0xff]  ;;  %v2021_v58 = vld [vmem:[%s4225_s7 + $0x18] sm:$0xff] }
 0x3b7   : > { %v1830_v59 = vpop.f32.mrb[4].mxu0 }
 0x3b8   : > { %v3307_v60 = vpop.f32.mrb[5].mxu0  ;;  %v1834_v61 = vsel %vm1334_vm4, %v1830_v59, -inf }
 0x3b9   : > { %1835 = vmax.xlane.f32.xlu0 %v1834_v61  ;;  %v3144_v60 = vld [vmem:[%s4228_s2] ss:$0 sm:$0xff]  ;;  %s4234_s2 = scalar_lea.vmem %s4233_s1, %s3770_s8 }
 0x3c2   : > { %1346 = vrot.lane.b32.xlu1 %v3905_v42, %s3611_s24 }
 0x43a   : > { %v1337_v62 = vpop.xlane.xlu0 %1336 }
 0x43b   : > { %v1338_v63 = vsub.f32 %v1330_v50, %v1337_v62 }
 0x43d   : > { %v1339_v0 = vmul.f32 1.442695, %v1338_v63 }
 0x43e   : > { %v1502_v1 = vpop.xlane.xlu1 %1501 }
 0x43f   : > { %3538 = vpow2.f32 %v1339_v0  ;;  %v1503_v2 = vsub.f32 %v1496_v53, %v1502_v1  ;;  %v2023_v1 = vld [vmem:[%s4226_s6] sm:$0xff] }
 0x441   : > { %v1504_v3 = vmul.f32 1.442695, %v1503_v2 }
 0x442   : > { %v1347_v4 = vpop.permute.xlu1 %1346  ;;  %v1671_v5 = vpop.xlane.xlu0 %1670 }
 0x443   : > { %3540 = vpow2.f32 %v1504_v3  ;;  %v1672_v6 = vsub.f32 %v1665_v56, %v1671_v5  ;;  %3279 = vmatpush3.msra.mxu1 %v1347_v4 }
 0x444   : > { %3288 = vmatprep.subr.mxu1 %v3606_v38 }
 0x445   : > { %v1673_v7 = vmul.f32 1.442695, %v1672_v6 }
 0x446   : > { %v1836_v8 = vpop.xlane.xlu0 %1835 }
 0x447   : > { %3542 = vpow2.f32 %v1673_v7  ;;  %v1837_v9 = vsub.f32 %v1830_v59, %v1836_v8  ;;  %v3444_v59 = vpack.c.bf16 %v2021_v58, %v2020_v57  ;;  %v2364_v58 = vld [vmem:[%s3835_s22 + $0x20] sm:$0xff] }
 0x449   : > { %v3539_v10 = vpop.eup %3538  ;;  %v1838_v11 = vmul.f32 1.442695, %v1837_v9 }
 0x44a   : > { %v1341_v12 = vsel %vm1334_vm4, %v3539_v10, 0.0 }
 0x44b   : > { %3544 = vpow2.f32 %v1838_v11  ;;  %1342 = vadd.xlane.f32.xlu1 %v1341_v12 }
 0x44d   : > { %v3541_v13 = vpop.eup %3540 }
 0x44e   : > { %v1506_v14 = vsel %vm1334_vm4, %v3541_v13, 0.0 }
 0x44f   : > { %1507 = vadd.xlane.f32.xlu0 %v1506_v14 }
 0x451   : > { %v3543_v15 = vpop.eup %3542 }
 0x452   : > { %v1675_v16 = vsel %vm1334_vm4, %v3543_v15, 0.0 }
 0x453   : > { %1676 = vadd.xlane.f32.xlu1 %v1675_v16 }
 0x455   : > { %v3545_v17 = vpop.eup %3544 }
 0x456   : > { %v1840_v18 = vsel %vm1334_vm4, %v3545_v17, 0.0 }
 0x457   : > { %1841 = vadd.xlane.f32.xlu0 %v1840_v18 }
 0x464   : > { %1680 = vrot.lane.b32.xlu1 %v3909_v43, %s3611_s24  ;;  %s4229_s24 = sld [smem:[#allocation20_spill]] }
 0x468   : > { %1845 = vrot.lane.b32.xlu1 %v3909_v43, %s3612_s0 }
 0x46d   : > { %1511 = vrot.lane.b32.xlu0 %v3905_v42, %s3612_s0  ;;  %v3436_v42 = vpack.c.bf16 %v1929_v41, %v1928_v40  ;;  %s4230_s0 = scalar_lea.vmem %s4229_s24, %s3770_s8 }
 0x46e   : > { %v3147_v2 = vld [vmem:[%s4230_s0] ss:$0 sm:$0xff] }
 0x46f   : > { %3437 = vmatprep.subr.bf16.mxu0 %v3436_v42 }
 0x470   : > { %3439 = vmatpush3.bf16.msra.mxu0 %v3436_v42 }
 0x471   : > { %3335 = vmatprep.subr.mxu0 %v2023_v1 }
 0x4d8   : > { %v1343_v19 = vpop.xlane.xlu1 %1342 }
 0x4d9   : > { %3546 = vrcp.f32 %v1343_v19 }
 0x4dc   : > { %v1508_v20 = vpop.xlane.xlu0 %1507 }
 0x4dd   : > { %3548 = vrcp.f32 %v1508_v20 }
 0x4e0   : > { %v1677_v21 = vpop.xlane.xlu1 %1676 }
 0x4e1   : > { %3550 = vrcp.f32 %v1677_v21 }
 0x4e3   : > { %v3547_v22 = vpop.eup %3546 }
 0x4e4   : > { %v1345_v23 = vmul.f32 %v3547_v22, %v3539_v10  ;;  %v1842_v24 = vpop.xlane.xlu0 %1841  ;;  %v1681_v27 = vpop.permute.xlu1 %1680 }
 0x4e5   : > { %3552 = vrcp.f32 %v1842_v24 }
 0x4e6   : > { %3281 = vmatmul.mubr.msk.f32.vlgmr.msra.gmra.mrb[4].mxu1 %vm1334_vm4, %v1345_v23 }
 0x4e7   : > { %v3549_v25 = vpop.eup %3548  ;;  %3290 = vmatprep.mubr.msk.f32.mxu1 %vm3607_vm2, %v3606_v38 }
 0x4e8   : > { %v1510_v26 = vmul.f32 %v3549_v25, %v3541_v13  ;;  %v1512_v28 = vpop.permute.xlu0 %1511  ;;  %v1846_v31 = vpop.permute.xlu1 %1845 }
 0x4e9   : > { %3289 = vmatpush3.msra.mxu1 %v1512_v28  ;;  %v2250_v28 = vld [vmem:[%s3821_s29] sm:$0xff] }
 0x4ea   : > { %3291 = vmatmul.mubr.msk.f32.vlgmr.msra.gmra.mrb[6].mxu1 %vm1334_vm4, %v1510_v26  ;;  %3298 = vmatprep.subr.mxu1 %v3606_v38 }
 0x4eb   : > { %v3551_v29 = vpop.eup %3550  ;;  %3299 = vmatpush3.msra.mxu1 %v1681_v27  ;;  %3300 = vmatprep.mubr.msk.f32.mxu1 %vm3607_vm2, %v3606_v38 }
 0x4ec   : > { %v1679_v30 = vmul.f32 %v3551_v29, %v3543_v15  ;;  %3308 = vmatprep.subr.mxu1 %v3606_v38  ;;  %v2251_v29 = vld [vmem:[%s3821_s29 + $0x8] sm:$0xff] }
 0x4ee   : > { %3301 = vmatmul.mubr.msk.f32.vlgmr.msra.gmra.mrb[8].mxu1 %vm1334_vm4, %v1679_v30  ;;  %v3448_v30 = vpack.c.bf16 %v2251_v29, %v2250_v28 }
 0x4ef   : > { %v3553_v32 = vpop.eup %3552  ;;  %3309 = vmatpush3.msra.mxu1 %v1846_v31  ;;  %3310 = vmatprep.mubr.msk.f32.mxu1 %vm3607_vm2, %v3606_v38  ;;  %v2252_v31 = vld [vmem:[%s3821_s29 + $0x10] sm:$0xff] }
 0x4f0   : > { %v1844_v33 = vmul.f32 %v3553_v32, %v3545_v17  ;;  %3441 = vmatprep.subr.bf16.mxu1 %v3440_v47  ;;  %v2253_v32 = vld [vmem:[%s3821_s29 + $0x18] sm:$0xff]  ;;  %s4239_s29 = sld [smem:[#allocation7_spill]] }
 0x4f2   : > { %3311 = vmatmul.mubr.msk.f32.vlgmr.msra.gmra.mrb[10].mxu1 %vm1334_vm4, %v1844_v33  ;;  %v3452_v33 = vpack.c.bf16 %v2253_v32, %v2252_v31 }
 0x4f3   : > { %3443 = vmatpush3.bf16.msra.mxu1 %v3440_v47 }
 0x4f4   : > { %3445 = vmatprep.subr.bf16.mxu1 %v3444_v59 }
 0x4f6   : > { %p3167_p5 = scmp.ne.s32.totalorder %s4239_s29, 1 }
 0x4f7   : > { %3447 = vmatpush3.bf16.msra.mxu1 %v3444_v59  ;;  %v2365_v59 = vld [vmem:[%s3835_s22 + $0x28] sm:$0xff]  ;;  %s4240_s26 = sld [smem:[#allocation26_spill]] (!%p3167_p5)  ;;  %vm3615_vm5 = vmmov (!%p3167_p5), 0   ;;  %vm2698_vm6 = vcmask (!%p3167_p5), 1040384   ;;  %s4242_s29 = sld [smem:[#allocation27_spill]] (!%p3167_p5) }
 0x4f8   : > { %3449 = vmatprep.subr.bf16.mxu1 %v3448_v30  ;;  %s4243_s24 = sld [smem:[#allocation29_spill]] (!%p3167_p5) }
 0x5b9   : > { %v1418_v43 = vpop.f32.mrb[4].mxu1 }
 0x5ba   : > { %v3282_v44 = vpop.f32.mrb[5].mxu1 }
 0x5bb   : > { %v3153_v44 = vld [vmem:[%s4234_s2] ss:$0 sm:$0xff] }
 0x5bd   : > { %v1583_v38 = vpop.f32.mrb[6].mxu1 }
 0x5be   : > { %1588 = vrot.lane.b32.xlu0 %v1583_v38, %s3613_s30  ;;  %v3292_v48 = vpop.f32.mrb[7].mxu1 }
 0x5c1   : > { %v1752_v49 = vpop.f32.mrb[8].mxu1 }
 0x5c2   : > { %v3302_v50 = vpop.f32.mrb[9].mxu1 }
 0x5c5   : > { %v1917_v51 = vpop.f32.mrb[10].mxu1 }
 0x5c6   : > { %1922 = vrot.lane.b32.xlu1 %v1917_v51, %s3613_s30  ;;  %v3312_v52 = vpop.f32.mrb[11].mxu1  ;;  %s4231_s30 = sld [smem:[#allocation22_spill]] }
 0x5c7   : > { %v2360_v52 = vld [vmem:[%s3835_s22] sm:$0xff] }
 0x5cc   : > { %s4232_s6 = scalar_lea.vmem %s4231_s30, %s3770_s8  ;;  %s4237_s30 = scalar_lea.vmem %s4159_s16, %s3770_s8 }
 0x5cd   : > { %v3150_v9 = vld [vmem:[%s4232_s6] ss:$0 sm:$0xff] }
 0x630   : > { %v1589_v53 = vpop.permute.xlu0 %1588 }
 0x631   : > { %v1591_v54 = vsel %vm1259_vm3, %v1418_v43, %v1589_v53  ;;  %v2361_v53 = vld [vmem:[%s3835_s22 + $0x8] sm:$0xff] }
 0x632   : > { %3321 = vmatprep.mubr.msk.f32.mxu0 %vm1174_vm1, %v1591_v54  ;;  %v3456_v54 = vpack.c.bf16 %v2361_v53, %v2360_v52 }
 0x638   : > { %v1923_v55 = vpop.permute.xlu1 %1922 }
 0x639   : > { %v1925_v56 = vsel %vm1259_vm3, %v1752_v49, %v1923_v55  ;;  %v2362_v55 = vld [vmem:[%s3835_s22 + $0x10] sm:$0xff] }
 0x63a   : > { %3322 = vmatmul.mubr.msk.f32.vlgmr.msra.gmra.mrb[6].mxu0 %vm1174_vm1, %v1925_v56  ;;  %v2363_v56 = vld [vmem:[%s3835_s22 + $0x18] sm:$0xff] }
 0x63b   : > { %3336 = vmatpush3.msra.mxu0 %v2023_v1  ;;  %v3460_v57 = vpack.c.bf16 %v2363_v56, %v2362_v55  ;;  %v2369_v1 = vld [vmem:[%s3835_s22 + $0x48] sm:$0xff]  ;;  %v3162_v56 = vld [vmem:[%s1100_s23] ss:$0 sm:$0xff] }
 0x63c   : > { %3457 = vmatprep.subr.bf16.mxu0 %v3456_v54 }
 0x70d   : > { %v3323_v61 = vpop.f32.mrb[6].mxu0 }
 0x70e   : > { %v2009_v62 = vpop.f32.mrb[7].mxu0  ;;  %v2015_v0 = vadd.f32 %v3323_v61, %v3144_v60  ;;  %v2366_v61 = vld [vmem:[%s3835_s22 + $0x30] sm:$0xff] }
 0x70f   : > { %v2010_v63 = vadd.f32 %v3144_v60, %v2009_v62  ;;  %v3464_v60 = vpack.c.bf16 %v2365_v59, %v2364_v58  ;;  %v2367_v62 = vld [vmem:[%s3835_s22 + $0x38] sm:$0xff] }
 0x711   : > { %3332 = vmatprep.mubr.msk.f32.mxu1 %vm1174_vm1, %v2010_v63 }
 0x712   : > { %3333 = vmatmul.mubr.msk.f32.vlgmr.msra.gmra.mrb[12].mxu1 %vm1174_vm1, %v2015_v0 }
 0x713   : > { %3451 = vmatpush3.bf16.msra.mxu1 %v3448_v30 }
 0x714   : > { %3453 = vmatprep.subr.bf16.mxu1 %v3452_v33 }
 0x717   : > { %3455 = vmatpush3.bf16.msra.mxu1 %v3452_v33 }
 0x7e5   : > { %v3334_v3 = vpop.f32.mrb[12].mxu1 }
 0x7e6   : > { %v2109_v4 = vadd.f32 %v3334_v3, %v3147_v2  ;;  %v2103_v5 = vpop.f32.mrb[13].mxu1 }
 0x7e7   : > { %v2104_v6 = vadd.f32 %v3147_v2, %v2103_v5  ;;  %v2370_v2 = vld [vmem:[%s3835_s22 + $0x50] sm:$0xff] }
 0x7e8   : > { %v2113_v8 = vmax.f32 %v2109_v4, 0.0  ;;  %v2371_v4 = vld [vmem:[%s3835_s22 + $0x58] sm:$0xff] }
 0x7e9   : > { %v2112_v7 = vmax.f32 %v2104_v6, 0.0  ;;  %v3476_v5 = vpack.c.bf16 %v2371_v4, %v2370_v2  ;;  %v2372_v6 = vld [vmem:[%s3835_s22 + $0x60] sm:$0xff] }
 0x7eb   : > { %3337 = vmatprep.mubr.msk.f32.mxu0 %vm1334_vm4, %v2112_v7  ;;  %v2373_v7 = vld [vmem:[%s3835_s22 + $0x68] sm:$0xff] }
 0x7ec   : > { %3338 = vmatmul.mubr.msk.f32.vlgmr.msra.gmra.mrb[8].mxu0 %vm1334_vm4, %v2113_v8  ;;  %v3480_v8 = vpack.c.bf16 %v2373_v7, %v2372_v6 }
 0x7ed   : > { %3459 = vmatpush3.bf16.msra.mxu0 %v3456_v54 }
 0x7ee   : > { %3461 = vmatprep.subr.bf16.mxu0 %v3460_v57 }
 0x7f1   : > { %3463 = vmatpush3.bf16.msra.mxu0 %v3460_v57 }
 0x7f2   : > { %3465 = vmatprep.subr.bf16.mxu0 %v3464_v60 }
 0x7f5   : > { %3467 = vmatpush3.bf16.msra.mxu0 %v3464_v60 }
 0x8bf   : > { %v3339_v10 = vpop.f32.mrb[8].mxu0 }
 0x8c0   : > { %v2198_v11 = vadd.f32 %v3339_v10, %v3150_v9  ;;  %v2192_v12 = vpop.f32.mrb[9].mxu0  ;;  %v2375_v10 = vld [vmem:[%s3835_s22 + $0x78] sm:$0xff] }
 0x8c1   : > { %v2193_v13 = vadd.f32 %v3150_v9, %v2192_v12  ;;  %v2374_v9 = vld [vmem:[%s3835_s22 + $0x70] sm:$0xff]  ;;  %v2458_v12 = vld [vmem:[%s3840_s28] sm:$0xff] }
 0x8c2   : > { %v2202_v14 = vadd.f32 %v2198_v11, %v2015_v0  ;;  %v2368_v0 = vld [vmem:[%s3835_s22 + $0x40] sm:$0xff]  ;;  %v3484_v11 = vpack.c.bf16 %v2375_v10, %v2374_v9 }
 0x8c3   : > { %v2201_v15 = vadd.f32 %v2193_v13, %v2010_v63  ;;  %v3468_v63 = vpack.c.bf16 %v2367_v62, %v2366_v61  ;;  %v3472_v3 = vpack.c.bf16 %v2369_v1, %v2368_v0  ;;  %v2459_v13 = vld [vmem:[%s3840_s28 + $0x8] sm:$0xff] }
 0x8c4   : > { %v2204_v16 = vadd.f32 %v2202_v14, %v3890_v37  ;;  %v3488_v14 = vpack.c.bf16 %v2459_v13, %v2458_v12 }
 0x8c5   : > { %v2203_v17 = vadd.f32 %v2201_v15, %v3886_v35  ;;  %3469 = vmatprep.subr.bf16.mxu0 %v3468_v63  ;;  %v3155_v15 = vld [vmem:[%s4236_s4] ss:$0 sm:$0xff] }
 0x8c6   : > { %v2210_v18 = vsel %vm1174_vm1, %v2204_v16, 0.0  ;;  %3471 = vmatpush3.bf16.msra.mxu0 %v3468_v63  ;;  %3489 = vmatprep.subr.bf16.mxu1 %v3488_v14 }
 0x8c7   : > { %2211 = vadd.xlane.f32.xlu1 %v2210_v18  ;;  %v2207_v19 = vsel %vm1174_vm1, %v2203_v17, 0.0  ;;  %3473 = vmatprep.subr.bf16.mxu0 %v3472_v3 }
 0x8c8   : > { %2208 = vadd.xlane.f32.xlu0 %v2207_v19 }
 0x8ca   : > { %3475 = vmatpush3.bf16.msra.mxu0 %v3472_v3 }
 0x8cb   : > { %3477 = vmatprep.subr.bf16.mxu0 %v3476_v5 }
 0x8ce   : > { %3479 = vmatpush3.bf16.msra.mxu0 %v3476_v5 }
 0x8cf   : > { %3481 = vmatprep.subr.bf16.mxu0 %v3480_v8 }
 0x8d2   : > { %3483 = vmatpush3.bf16.msra.mxu0 %v3480_v8 }
 0x8d3   : > { %3485 = vmatprep.subr.bf16.mxu0 %v3484_v11 }
 0x8d6   : > { %3487 = vmatpush3.bf16.msra.mxu0 %v3484_v11 }
 0x954   : > { %v2212_v20 = vpop.xlane.xlu1 %2211 }
 0x955   : > { %v2215_v21 = vmul.f32 0.03125, %v2212_v20  ;;  %v2209_v22 = vpop.xlane.xlu0 %2208 }
 0x956   : > { %v2214_v23 = vmul.f32 0.03125, %v2209_v22 }
 0x957   : > { %v2217_v24 = vsub.f32 %v2204_v16, %v2215_v21 }
 0x958   : > { %v2216_v25 = vsub.f32 %v2203_v17, %v2214_v23 }
 0x959   : > { %v2219_v35 = vmul.f32 %v2217_v24, %v2217_v24 }
 0x95a   : > { %v2218_v26 = vmul.f32 %v2216_v25, %v2216_v25 }
 0x95b   : > { %v2223_v27 = vsel %vm1174_vm1, %v2219_v35, 0.0 }
 0x95c   : > { %v2220_v37 = vsel %vm1174_vm1, %v2218_v26, 0.0 }
 0x95d   : > { %2221 = vadd.xlane.f32.xlu0 %v2220_v37 }
 0x961   : > { %2224 = vadd.xlane.f32.xlu0 %v2223_v27 }
 0x9ea   : > { %v2222_v34 = vpop.xlane.xlu0 %2221 }
 0x9eb   : > { %v2226_v36 = vmul.f32 0.03125, %v2222_v34 }
 0x9ed   : > { %v2228_v39 = vadd.f32 1e-12, %v2226_v36 }
 0x9ee   : > { %v2225_v40 = vpop.xlane.xlu0 %2224 }
 0x9ef   : > { %3554 = vrsqrt.f32 %v2228_v39  ;;  %v2227_v41 = vmul.f32 0.03125, %v2225_v40  ;;  %v2460_v39 = vld [vmem:[%s3840_s28 + $0x10] sm:$0xff]  ;;  %v2461_v40 = vld [vmem:[%s3840_s28 + $0x18] sm:$0xff]  ;;  %s4241_s28 = sld [smem:[#allocation28_spill]] (!%p3167_p5) }
 0x9f1   : > { %v2229_v42 = vadd.f32 1e-12, %v2227_v41  ;;  %v3492_v41 = vpack.c.bf16 %v2461_v40, %v2460_v39 }
 0x9f3   : > { %3556 = vrsqrt.f32 %v2229_v42  ;;  %v3158_v42 = vld [vmem:[%s4237_s30] ss:$0 sm:$0xff] }
 0x9f5   : > { %v2786_v39 = vld [vmem:[%s4241_s28 + $0x8] sm:$0xff] (!%p3167_p5)  ;;  %v2787_v40 = vld [vmem:[%s4241_s28 + $0x10] sm:$0xff] (!%p3167_p5) }
 0x9f9   : > { %v3555_v43 = vpop.eup %3554 }
 0x9fa   : > { %v2232_v45 = vmul.f32 %v3555_v43, %v2216_v25 }
 0x9fc   : > { %v2240_v47 = vmul.f32 %v3153_v44, %v2232_v45 }
 0x9fd   : > { %v3557_v38 = vpop.eup %3556 }
 0x9fe   : > { %v2233_v48 = vmul.f32 %v3557_v38, %v2217_v24  ;;  %v4013_v49 = vadd.f32 %v3154_v46, %v2240_v47  ;;  %v2463_v47 = vld [vmem:[%s3849_s9] sm:$0xff] }
 0x9ff   : > { %v3159_v38 = vld [vmem:[%s1093_s11] ss:$0 sm:$0xff] }
 0xa00   : > { %v2241_v50 = vmul.f32 %v3153_v44, %v2233_v48  ;;  %3348 = vmatprep.mubr.msk.f32.mxu1 %vm1174_vm1, %v4013_v49 }
 0xa02   : > { %v4017_v51 = vadd.f32 %v3154_v46, %v2241_v50 }
 0xa04   : > { %3349 = vmatmul.mubr.msk.f32.vlgmr.msra.gmra.mrb[14].mxu1 %vm1174_vm1, %v4017_v51 }
 0xa05   : > { %3491 = vmatpush3.bf16.msra.mxu1 %v3488_v14 }
 0xa06   : > { %3493 = vmatprep.subr.bf16.mxu1 %v3492_v41 }
 0xa09   : > { %3495 = vmatpush3.bf16.msra.mxu1 %v3492_v41 }
 0xa0a   : > { %3397 = vmatprep.subr.mxu1 %v2463_v47 }
 0xad7   : > { %v3350_v16 = vpop.f32.mrb[14].mxu1 }
 0xad8   : > { %v2339_v17 = vadd.f32 %v3350_v16, %v3155_v15  ;;  %v2333_v18 = vpop.f32.mrb[15].mxu1 }
 0xad9   : > { %v2334_v19 = vadd.f32 %v3155_v15, %v2333_v18  ;;  %v3165_v18 = vld [vmem:[%s1103_s27] ss:$0 sm:$0xff] }
 0xada   : > { %v2343_v20 = vmul.f32 %v2339_v17, %v2339_v17 }
 0xadb   : > { %v2342_v21 = vmul.f32 %v2334_v19, %v2334_v19 }
 0xadc   : > { %v2345_v22 = vmul.f32 %v2343_v20, %v2339_v17 }
 0xadd   : > { %v2344_v23 = vmul.f32 %v2342_v21, %v2334_v19  ;;  %v3166_v21 = vld [vmem:[%s1106_s25] ss:$0 sm:$0xff] }
 0xade   : > { %v2347_v24 = vmul.f32 0.044715, %v2345_v22 }
 0xadf   : > { %v2346_v25 = vmul.f32 0.044715, %v2344_v23 }
 0xae0   : > { %v2349_v26 = vadd.f32 %v2347_v24, %v2339_v17 }
 0xae1   : > { %v2348_v37 = vadd.f32 %v2346_v25, %v2334_v19 }
 0xae2   : > { %v2351_v35 = vmul.f32 0.7978846, %v2349_v26 }
 0xae3   : > { %v2350_v27 = vmul.f32 0.7978846, %v2348_v37  ;;  %v2700_v37 = vld [vmem:[%s4240_s26] sm:$0xff] (!%p3167_p5) }
 0xae4   : > { %3558 = vtanh.f32 %v2351_v35  ;;  %v2701_v35 = vld [vmem:[%s4240_s26 + $0x8] sm:$0xff] (!%p3167_p5) }
 0xae5   : > { %3560 = vtanh.f32 %v2350_v27  ;;  %v2702_v27 = vld [vmem:[%s4240_s26 + $0x10] sm:$0xff] (!%p3167_p5) }
 0xaee   : > { %v3559_v28 = vpop.eup %3558 }
 0xaef   : > { %v3561_v29 = vpop.eup %3560  ;;  %v2355_v30 = vadd.f32 1.0, %v3559_v28  ;;  %v3614_v28 = vmov (!%p3167_p5), 0.0|0.0  }
 0xaf0   : > { %v2354_v31 = vadd.f32 1.0, %v3561_v29  ;;  %3496 = vmatprep.subr.bf16.mxu0 (!%p3167_p5), %v3614_v28  ;;  %v3497_v29 = vpack.c.bf16 (!%p3167_p5), %v2701_v35, %v2700_v37 }
 0xaf1   : > { %v2357_v32 = vmul.f32 0.5, %v2355_v30  ;;  %v2703_v30 = vld [vmem:[%s4240_s26 + $0x18] sm:$0xff] (!%p3167_p5) }
 0xaf2   : > { %v2356_v33 = vmul.f32 0.5, %v2354_v31  ;;  %v3616_v31 = vmov (!%p3167_p5), 0.0  }
 0xaf3   : > { %v2359_v36 = vmul.f32 %v2357_v32, %v2339_v17  ;;  %v3500_v32 = vpack.c.bf16 (!%p3167_p5), %v2703_v30, %v2702_v27 }
 0xaf4   : > { %v2358_v34 = vmul.f32 %v2356_v33, %v2334_v19 }
 0xaf6   : > { %3383 = vmatprep.mubr.f32.mxu0 %v2358_v34 }
 0xaf7   : > { %3384 = vmatmul.mubr.f32.vlgmr.msra.gmra.mrb[10].mxu0 %v2359_v36  ;;  %v2785_v36 = vld [vmem:[%s4241_s28] sm:$0xff] (!%p3167_p5) }
 0xaf8   : > { %3410 = vmatprep.mubr.msk.f32.mxu0 (!%p3167_p5), %vm3615_vm5, %v3616_v31  ;;  %3498 = vmatpush3.bf16.msra.mxu0 (!%p3167_p5), %v3497_v29  ;;  %v3503_v41 = vpack.c.bf16 (!%p3167_p5), %v2786_v39, %v2785_v36 }
 0xaf9   : > { %3499 = vmatprep.subr.bf16.mxu0 (!%p3167_p5), %v3614_v28 }
 0xafc   : > { %3501 = vmatpush3.bf16.msra.mxu0 (!%p3167_p5), %v3500_v32 }
 0xbca   : > { %v3385_v43 = vpop.f32.mrb[10].mxu0 }
 0xbcb   : > { %v2449_v44 = vpop.f32.mrb[11].mxu0  ;;  %v2455_v46 = vadd.f32 %v3385_v43, %v3158_v42 }
 0xbcc   : > { %v2450_v45 = vadd.f32 %v3158_v42, %v2449_v44  ;;  %v2788_v42 = vld [vmem:[%s4241_s28 + $0x18] sm:$0xff] (!%p3167_p5)  ;;  %v3168_v44 = vld [vmem:[%s4242_s29] ss:$0 sm:$0xff] (!%p3167_p5) }
 0xbcd   : > { %v3506_v43 = vpack.c.bf16 (!%p3167_p5), %v2788_v42, %v2787_v40 }
 0xbce   : > { %3394 = vmatprep.mubr.msk.f32.mxu1 %vm1174_vm1, %v2450_v45 }
 0xbcf   : > { %3395 = vmatmul.mubr.msk.f32.vlgmr.msra.gmra.mrb[16].mxu1 %vm1174_vm1, %v2455_v46 }
 0xbd0   : > { %3398 = vmatpush3.msra.mxu1 %v2463_v47 }
 0xbd1   : > { %3502 = vmatprep.subr.bf16.mxu1 (!%p3167_p5), %v3614_v28 }
 0xca2   : > { %v3396_v48 = vpop.f32.mrb[16].mxu1 }
 0xca3   : > { %v2549_v50 = vadd.f32 %v3396_v48, %v3159_v38  ;;  %v2543_v52 = vpop.f32.mrb[17].mxu1  ;;  %v3170_v48 = vld [vmem:[%s4243_s24] ss:$0 sm:$0xff] (!%p3167_p5) }
 0xca4   : > { %v2544_v53 = vadd.f32 %v3159_v38, %v2543_v52 }
 0xca5   : > { %v2553_v55 = vmax.f32 %v2549_v50, 0.0 }
 0xca6   : > { %v2552_v54 = vmax.f32 %v2544_v53, 0.0 }
 0xca8   : > { %3399 = vmatprep.mubr.msk.f32.mxu1 %vm1334_vm4, %v2552_v54 }
 0xca9   : > { %3400 = vmatmul.mubr.msk.f32.vlgmr.msra.gmra.mrb[18].mxu1 %vm1334_vm4, %v2553_v55 }
 0xcaa   : > { %3421 = vmatprep.mubr.msk.f32.mxu1 (!%p3167_p5), %vm3615_vm5, %v3616_v31  ;;  %3504 = vmatpush3.bf16.msra.mxu1 (!%p3167_p5), %v3503_v41 }
 0xcab   : > { %3505 = vmatprep.subr.bf16.mxu1 (!%p3167_p5), %v3614_v28 }
 0xcae   : > { %3507 = vmatpush3.bf16.msra.mxu1 (!%p3167_p5), %v3506_v43 }
 0xd7c   : > { %v3401_v57 = vpop.f32.mrb[18].mxu1 }
 0xd7d   : > { %v2638_v58 = vadd.f32 %v3401_v57, %v3162_v56  ;;  %v2632_v59 = vpop.f32.mrb[19].mxu1 }
 0xd7e   : > { %v2633_v60 = vadd.f32 %v3162_v56, %v2632_v59 }
 0xd7f   : > { %v2642_v61 = vadd.f32 %v2638_v58, %v2455_v46 }
 0xd80   : > { %v2641_v62 = vadd.f32 %v2633_v60, %v2450_v45 }
 0xd81   : > { %v2644_v63 = vadd.f32 %v2642_v61, %v4017_v51 }
 0xd82   : > { %v2643_v0 = vadd.f32 %v2641_v62, %v4013_v49 }
 0xd83   : > { %v2650_v1 = vsel %vm1174_vm1, %v2644_v63, 0.0 }
 0xd84   : > { %2651 = vadd.xlane.f32.xlu0 %v2650_v1  ;;  %v2647_v2 = vsel %vm1174_vm1, %v2643_v0, 0.0 }
 0xd85   : > { %2648 = vadd.xlane.f32.xlu1 %v2647_v2 }
 0xe11   : > { %v2652_v3 = vpop.xlane.xlu0 %2651 }
 0xe12   : > { %v2654_v4 = vmul.f32 0.03125, %v2652_v3  ;;  %v2649_v5 = vpop.xlane.xlu1 %2648 }
 0xe13   : > { %v2653_v6 = vmul.f32 0.03125, %v2649_v5 }
 0xe14   : > { %v2656_v7 = vsub.f32 %v2644_v63, %v2654_v4 }
 0xe15   : > { %v2655_v8 = vsub.f32 %v2643_v0, %v2653_v6 }
 0xe16   : > { %v2658_v9 = vmul.f32 %v2656_v7, %v2656_v7 }
 0xe17   : > { %v2657_v10 = vmul.f32 %v2655_v8, %v2655_v8 }
 0xe18   : > { %v2662_v11 = vsel %vm1174_vm1, %v2658_v9, 0.0 }
 0xe19   : > { %2663 = vadd.xlane.f32.xlu0 %v2662_v11  ;;  %v2659_v49 = vsel %vm1174_vm1, %v2657_v10, 0.0 }
 0xe1a   : > { %2660 = vadd.xlane.f32.xlu1 %v2659_v49 }
 0xea6   : > { %v2664_v51 = vpop.xlane.xlu0 %2663 }
 0xea7   : > { %v2666_v12 = vmul.f32 0.03125, %v2664_v51  ;;  %v2661_v13 = vpop.xlane.xlu1 %2660 }
 0xea8   : > { %v2665_v14 = vmul.f32 0.03125, %v2661_v13 }
 0xea9   : > { %v2668_v15 = vadd.f32 1e-12, %v2666_v12 }
 0xeaa   : > { %v2667_v16 = vadd.f32 1e-12, %v2665_v14 }
 0xeab   : > { %3562 = vrsqrt.f32 %v2668_v15 }
 0xeac   : > { %3564 = vrsqrt.f32 %v2667_v16 }
 0xeb5   : > { %v3563_v17 = vpop.eup %3562 }
 0xeb6   : > { %v3565_v19 = vpop.eup %3564  ;;  %v2672_v20 = vmul.f32 %v3563_v17, %v2656_v7 }
 0xeb7   : > { %v2671_v22 = vmul.f32 %v3565_v19, %v2655_v8  ;;  %2694 = sbr.rel (%p3167_p5) target bundleno = 4215 (0x1077), region = 136 }
 0xeb8   : > { %v2680_v23 = vmul.f32 %v3165_v18, %v2672_v20 }
 0xeb9   : > { %v2679_v24 = vmul.f32 %v3165_v18, %v2671_v22 }
 0xeba   : > { %v2688_v25 = vadd.f32 %v3166_v21, %v2680_v23 }
 0xebb   : > { %v2687_v26 = vadd.f32 %v3166_v21, %v2679_v24 }
 0xebc   : > { %2690 = vst.msk [vmem:[#allocation2 + $0x8] sm:$0xff] %vm1174_vm1, %v2688_v25  ;;  %v2696_v33 = vrot.slane (!%p3167_p5), %v2688_v25, 7 }
 0xebd   : > { %2689 = vst.msk [vmem:[#allocation2] sm:$0xff] %vm1174_vm1, %v2687_v26 }
 0xebe   : > { %v2699_v34 = vsel %vm2698_vm6, %v2687_v26, %v2696_v33 }
 0xebf   : > { %3411 = vmatmul.mubr.msk.f32.vlgmr.msra.gmra.mrb[0].mxu0 %vm1174_vm1, %v2699_v34 }
 0xf92   : > { %v2780_v45 = vpop.f32.mrb[0].mxu0 }
 0xf93   : > { %v2781_v46 = vadd.f32 %v3168_v44, %v2780_v45  ;;  %v3412_v47 = vpop.f32.mrb[1].mxu0 }
 0xf95   : > { %3566 = vtanh.f32 %v2781_v46 }
 0xf9f   : > { %v3567_v38 = vpop.eup %3566 }
 0xfa0   : > { %3422 = vmatmul.mubr.msk.f32.vlgmr.msra.gmra.mrb[0].mxu1 %vm1174_vm1, %v3567_v38 }
0x1073   : > { %v2865_v50 = vpop.f32.mrb[0].mxu1 }
0x1074   : > { %v2866_v52 = vadd.f32 %v3170_v48, %v2865_v50  ;;  %v3423_v53 = vpop.f32.mrb[1].mxu1 }
0x1076   : > { %2869 = vst [vmem:[#allocation3] sm:$0x3] %v2866_v52 }
0x1077 PF: > { %s4244_s0 = sld [smem:[#allocation7_spill]]  ;;  %s3617_s25 = smov [#allocation3]  }
0x1078   : > { %s2877_s8 = sshll.u32 %s3617_s25, 4  ;;  %s2878_s8 = int_to_ptr.vmem [resolvable:$true] %s2877_s8 }
0x1079   : > { %s3568_s4 = scalar_lea.vmem %s2878_s8, 32  ;;  %p3575_p10 = scmp.lt.s32.totalorder %s2878_s8, %s2878_s8 }
0x107a   : > { %p3569_p7 = scmp.ne.s32.totalorder %s2878_s8, %s3568_s4  ;;  %p3576_p11 = scmp.lt.s32.totalorder %s3568_s4, %s3568_s4 }
0x107c   : > { %p3577_p12 = por %p3576_p11, %p3575_p10 }
0x107d   : > { %p3512_p6 = scmp.eq.s32.totalorder %s4244_s0, 1 }
0x107f   : > { %p3570_p8 = pnand %p3569_p7, %p3512_p6 }
0x1081   : > { %p3571_p9 = pneg %p3570_p8 }
0x1083   : > { %p3578_p13 = pnand %p3577_p12, %p3571_p9 }
0x1085   : > { %3581 = shalt.err (!%p3578_p13)
}
0x1086   : > { %s4245_s30 = sld [smem:[#allocation30_spill]] }
0x108c   : > { %s3582_s6 = scalar_lea.hbm %s4245_s30, 32 }
0x108d   : > { %p3583_p0 = scmp.ne.s32.totalorder %s4245_s30, %s3582_s6  ;;  %p3588_p3 = scmp.lt.u32.totalorder %s3582_s6, %s4245_s30 }
0x108f   : > { %p3584_p1 = pnand %p3583_p0, %p3512_p6 }
0x1091   : > { %p3585_p2 = pneg %p3584_p1 }
0x1093   : > { %p3590_p4 = pnand %p3588_p3, %p3585_p2 }
0x1095   : > { %3593 = shalt.err (!%p3590_p4)
}
0x1096   : > { %3509 = dma.vmem_to_hbm [thread:$0]  (%p3512_p6), %s2878_s8, 32, %s4245_s30, [#allocation4]  }
0x1097   : > { %3599 = dma.done.wait (%p3512_p6), [#allocation4], 32  }
0x1098   : > { %3601 = vsyncadd (%p3512_p6), [#allocation4], 4294967264 }
0x1099 PF: > { %s4246_s2 = sld [smem:[#allocation6_spill]] }
0x109f   : > { %s38_s7 = sadd.s32 1, %s4246_s2  }
0x10a0   : > { %p35_p5 = scmp.ge.s32.totalorder %s38_s7, 4  }
0x10a2   :  { %37 = sbr.rel (!%p35_p5) target bundleno = 21 (0x15), region = 220 }
0x10a9   :  { %2890 = vsyncpa [#allocation4], 1 }
0x10aa   :  { %2892 = vsyncpa [#allocation4 + $0x1], 1 }

</bundles_post_ra>
